<compile_context>
chip_gen: v6e
topology: v6e:2x2x1
jax: 0.10.0
libtpu: 0.0.40
codegen_flags: <defaults>
</compile_context>

<pallas_src>
import numpy as np
import jax
import jax.numpy as jnp
from jax.experimental import pallas as pl
from jax.experimental.pallas import tpu as pltpu

# ---- configuration (matches the PyTorch module defaults) --------------------
B = 2          # batch
A = 6          # NUM_INTERSECTIONS (num agents)
NEI = 5        # min(TOP_K_ADJACENCY, num agents)
F = 20         # len_feature
HDIM = 32      # CNN_layers[0][0]  (per-head dim; MLP_layers = [32, 32])
HEAD = 5       # CNN_heads[0]
ACT = 4        # len(PHASE)

BA = B * A          # 12   batch*agents rows
R = BA * NEI        # 60   batch*agents*neighbour rows
R64 = 64            # R rounded up to a sublane multiple (pad rows are inert)
DH = HDIM * HEAD    # 160  fused per-head fc1 width

# packed parameter slab layout (all row starts 8-aligned)
SLAB_A_ROWS = 40    # width DH  : wq rows [0,32), bq row 32
SLAB_B_ROWS = 240   # width HDIM: w1 [0,20), b1 row 24, w2 [32,64), b2 row 64,
                    #             w_final [72,232) (lanes [0,ACT)), b_final row 232

# static agent-query gather (row g*NEI+n -> agent g), padded to 64 rows
_EXPAND64 = np.zeros((R64, BA), np.float32)
_EXPAND64[np.arange(R), np.arange(R) // NEI] = 1.0


# ---------------------------------------------------------------------------
# Kernel: one invocation computes the full forward pass for all batch elements
# ---------------------------------------------------------------------------
def network_kernel(feats_ref, qk_gather_ref, slab_a_ref, slab_b_ref, out_ref):
    f32 = jnp.float32
    bf16 = jnp.bfloat16

    def mxu(a, b):
        # bf16 MXU operands, f32 accumulation (no multi-pass f32 emulation)
        return jnp.dot(a.astype(bf16), b.astype(bf16), preferred_element_type=f32)

    # ---- static segment / broadcast matrices, generated on the (idle) VPU ---
    def seg_indicator(shape, seg_len, big_axis):
        # out[i, j] = 1.0 iff (index along big_axis) // seg_len == (other index)
        big = jax.lax.broadcasted_iota(jnp.int32, shape, big_axis)
        small = jax.lax.broadcasted_iota(jnp.int32, shape, 1 - big_axis)
        return ((big >= small * seg_len) & (big < small * seg_len + seg_len)).astype(f32)

    expand = seg_indicator((R64, BA), NEI, 0)   # [64,12] row r -> agent r//NEI (pad rows zero)
    seg = seg_indicator((BA, R64), NEI, 1)      # [12,64] sum over each agent's NEI rows
    sel = seg_indicator((DH, HEAD), HDIM, 0)    # [160,5] sum over each head's 32 lanes
    hbc = seg_indicator((HEAD, DH), HDIM, 1)    # [5,160] broadcast head scalar to its 32 lanes
    gi = jax.lax.broadcasted_iota(jnp.int32, (BA, R64), 0)
    ri = jax.lax.broadcasted_iota(jnp.int32, (BA, R64), 1)
    first_sel = (ri == gi * NEI).astype(f32)    # [12,64] picks the first row of each group

    # ---- packed parameter slab slices (static, 8-aligned row offsets) -------
    w1 = slab_b_ref[0:F, :]             # [20,32]
    b1 = slab_b_ref[24:25, :]           # [1,32]
    w2 = slab_b_ref[32:64, :]           # [32,32]
    b2 = slab_b_ref[64:65, :]           # [1,32]
    wfin = slab_b_ref[72:232, :]        # [160,32] head-mean+fc2+output fold (lanes >= ACT zero)
    bfin = slab_b_ref[232:233, :]       # [1,32]
    wq = slab_a_ref[0:HDIM, :]          # [32,160] fused per-head fc1 (head-major columns)
    bq = slab_a_ref[HDIM:HDIM + 1, :]   # [1,160]

    # ---- MLP: Linear+ReLU, Linear+ReLU (all batch*agent rows at once) -------
    x = feats_ref[...]                               # [12,20]
    h1 = jnp.maximum(mxu(x, w1) + b1, 0.0)           # [12,32]
    feat = jnp.maximum(mxu(h1, w2) + b2, 0.0)        # [12,32]

    # ---- fused fc1 projection; agent (q) and neighbour (k) gathers in ONE matmul
    proj = mxu(feat, wq)                             # [12,160]
    # fc1 bias is added AFTER the gather matmul on both paths (exact by linearity).
    qk = mxu(qk_gather_ref[...], proj) + bq          # [128,160]
    q = qk[0:R64, :]                                 # [64,160] agent query per neighbour row
    k = qk[R64:2 * R64, :]                           # [64,160] gathered neighbour features

    # ---- attention logits: per-(row, head) 32-lane dot via MXU segment-reduce
    logits = mxu(q * k, sel)                         # [64,5]

    # ---- softmax over each agent's NEI neighbours, per-group max stabilised --
    win = logits
    for s in range(1, NEI):                          # 4 XLU sublane rolls (off the MXU path)
        win = jnp.maximum(win, pltpu.roll(logits, shift=R64 - s, axis=0))
    gmax = mxu(first_sel, win)                       # [12,5] per-agent, per-head max
    expl = jnp.exp(logits - mxu(expand, gmax))       # [64,5] (pad rows harmless, masked by seg)
    denom = mxu(seg, expl)                           # [12,5]
    inv = pl.reciprocal(denom, approx=True)          # [12,5] EUP, 1 vreg
    p = expl * mxu(expand, inv)                      # [64,5]

    # ---- weighted context; head-mean + fc2 + output head folded into wfin ----
    pb = mxu(p, hbc)                                 # [64,160] p broadcast across head lanes
    ctx_heads = mxu(seg, pb * k)                     # [12,160] sum over neighbours
    out = mxu(ctx_heads, wfin) + bfin                # [12,32]  (only lanes < ACT meaningful)
    out_ref[...] = out[:, 0:ACT]                     # [12,4]


# ---------------------------------------------------------------------------
# Wrapper
# ---------------------------------------------------------------------------
@jax.jit
def network_forward(feats, adj, slab_a, slab_b):
    f32 = jnp.float32
    bf16 = jnp.bfloat16

    feats2d = feats.reshape(BA, F).astype(bf16)                         # [12,20]
    # block-diagonal (over batch) neighbour gather, padded to 64 rows
    adj_r = adj.astype(f32).reshape(B, A * NEI, A)                      # [2,30,6]
    adj_block = (adj_r[:, :, None, :] *
                 jnp.eye(B, dtype=f32)[:, None, :, None]).reshape(R, BA)
    adj_block = jnp.pad(adj_block, ((0, R64 - R), (0, 0)))              # [64,12]
    # one fused gather operand: rows [0,64) = agent-query gather, [64,128) = neighbours
    qk_gather = jnp.concatenate([jnp.asarray(_EXPAND64), adj_block],
                                axis=0).astype(bf16)                    # [128,12]

    operands = (feats2d, qk_gather, slab_a, slab_b)
    grid_spec = pltpu.PrefetchScalarGridSpec(
        num_scalar_prefetch=0,
        grid=(1,),
        in_specs=[pl.BlockSpec(x.shape, lambda i: (0, 0)) for x in operands],
        out_specs=pl.BlockSpec((BA, ACT), lambda i: (0, 0)),
    )
    out2d = pl.pallas_call(
        network_kernel,
        out_shape=jax.ShapeDtypeStruct((BA, ACT), jnp.float32),
        grid_spec=grid_spec,
        compiler_params=pltpu.CompilerParams(dimension_semantics=("arbitrary",)),
    )(*operands)
    return out2d.reshape(B, A, ACT)


# ---------------------------------------------------------------------------
# Parameters (deterministic, PyTorch nn.Linear layout W:[out,in], b:[out])
# ---------------------------------------------------------------------------
def init_params(key):
    keys = jax.random.split(key, 5)

    def lin(k, out_dim, in_dim):
        kw, kb = jax.random.split(k)
        bound = 1.0 / jnp.sqrt(jnp.float32(in_dim))
        W = jax.random.uniform(kw, (out_dim, in_dim), jnp.float32, -bound, bound)
        b = jax.random.uniform(kb, (out_dim,), jnp.float32, -bound, bound)
        return W, b

    W1, b1 = lin(keys[0], HDIM, F)                 # MLP.lay1
    W2, b2 = lin(keys[1], HDIM, HDIM)              # MLP.lay2
    Wfc1, bfc1 = lin(keys[2], HDIM * HEAD, HDIM)   # MultiHeadsAttModel.fc1
    Wfc2, bfc2 = lin(keys[3], HDIM, HDIM)          # MultiHeadsAttModel.fc2
    Wout, bout = lin(keys[4], ACT, HDIM)           # Network.fc
    return (W1, b1, W2, b2, Wfc1, bfc1, Wfc2, bfc2, Wout, bout)


def to_kernel_params(torch_params):
    """Pack all static weights into two bf16 slabs (built once per model).

    fc1 columns are re-ordered head-major (h*HDIM + d) so each head is a
    contiguous 32-lane segment; head-mean + fc2 + output head are folded into
    one [160, ACT] weight (no nonlinearity in between, so this is exact).
    """
    W1, b1, W2, b2, Wfc1, bfc1, Wfc2, bfc2, Wout, bout = torch_params
    f32 = jnp.float32

    wq = Wfc1.T.reshape(HDIM, HDIM, HEAD).transpose(0, 2, 1).reshape(HDIM, DH)
    bq = bfc1.reshape(HDIM, HEAD).T.reshape(DH)
    head_mean = jnp.tile(jnp.eye(HDIM, dtype=f32), (HEAD, 1)) / HEAD     # [160,32]
    w_final = head_mean @ Wfc2.T @ Wout.T                                # [160,4]
    b_final = bfc2 @ Wout.T + bout                                       # [4]

    slab_a = jnp.zeros((SLAB_A_ROWS, DH), f32)
    slab_a = slab_a.at[0:HDIM].set(wq).at[HDIM].set(bq)

    slab_b = jnp.zeros((SLAB_B_ROWS, HDIM), f32)
    slab_b = (slab_b.at[0:F].set(W1.T)
                    .at[24].set(b1)
                    .at[32:64].set(W2.T)
                    .at[64].set(b2)
                    .at[72:232, 0:ACT].set(w_final)
                    .at[232, 0:ACT].set(b_final))
    return slab_a.astype(jnp.bfloat16), slab_b.astype(jnp.bfloat16)


# ---------------------------------------------------------------------------
# Pure-JAX reference that mirrors the PyTorch forward exactly (f32)
# ---------------------------------------------------------------------------
def reference_forward(feats, adj, torch_params):
    W1, b1, W2, b2, Wfc1, bfc1, Wfc2, bfc2, Wout, bout = torch_params
    h = jax.nn.relu(feats @ W1.T + b1)
    feat = jax.nn.relu(h @ W2.T + b2)                        # [B, A, HDIM]
    Bsz, Ag, D = feat.shape
    agent_repr = feat[:, :, None, :]                         # [B, A, 1, D]
    neighbor_repr = jnp.broadcast_to(feat[:, None, :, :], (Bsz, Ag, Ag, D))
    neighbor_repr = jnp.matmul(adj, neighbor_repr)           # [B, A, NEI, D]
    a_head = (agent_repr @ Wfc1.T + bfc1).reshape(Bsz, Ag, 1, HDIM, HEAD)
    a_head = jnp.transpose(a_head, (0, 1, 4, 2, 3))          # [B, A, HEAD, 1, HDIM]
    n_head = (neighbor_repr @ Wfc1.T + bfc1).reshape(Bsz, Ag, NEI, HDIM, HEAD)
    n_head = jnp.transpose(n_head, (0, 1, 4, 2, 3))          # [B, A, HEAD, NEI, HDIM]
    att = jnp.matmul(a_head, jnp.swapaxes(n_head, -1, -2))   # [B, A, HEAD, 1, NEI]
    att = jax.nn.softmax(att, axis=-1)
    out = jnp.matmul(att, n_head).mean(axis=2).reshape(Bsz, Ag, HDIM)
    out = out @ Wfc2.T + bfc2
    return out @ Wout.T + bout


# ---------------------------------------------------------------------------
if __name__ == "__main__":
    key = jax.random.PRNGKey(0)
    kf, kp = jax.random.split(key)

    feats = jax.random.normal(kf, (B, A, F), jnp.float32)
    # deterministic one-hot adjacency: neighbour n of agent a is agent (a+n) % A
    nbr_idx = (jnp.arange(A)[:, None] + jnp.arange(NEI)[None, :]) % A    # [A, NEI]
    adj_one = jax.nn.one_hot(nbr_idx, A, dtype=jnp.float32)              # [A, NEI, A]
    adj = jnp.broadcast_to(adj_one[None], (B, A, NEI, A)) + 0.0          # [B, A, NEI, A]

    torch_params = init_params(kp)
    slab_a, slab_b = to_kernel_params(torch_params)

    out = network_forward(feats, adj, slab_a, slab_b)
    out = jax.block_until_ready(out)

    ref = reference_forward(feats, adj, torch_params)
    assert out.shape == (B, A, ACT), out.shape
    # tolerance covers the bf16 MXU operands and the approximate EUP reciprocal
    if not jnp.allclose(out, ref, atol=2e-2, rtol=2e-2):
        err = float(jnp.max(jnp.abs(out - ref)))
        raise AssertionError(f"Pallas kernel output mismatch vs reference (max abs err {err})")

    print("KERNEL_OK")
</pallas_src>

<mosaic_0001>
module attributes {stable_mosaic.version = 11 : i64} {
  func.func @network_kernel(%arg0: i32, %arg1: memref<12x20xbf16, #tpu.memory_space<vmem>>, %arg2: memref<128x12xbf16, #tpu.memory_space<vmem>>, %arg3: memref<40x160xbf16, #tpu.memory_space<vmem>>, %arg4: memref<240x32xbf16, #tpu.memory_space<vmem>>, %arg5: memref<12x4xf32, #tpu.memory_space<vmem>>) attributes {dimension_semantics = [#tpu.dimension_semantics<arbitrary>], iteration_bounds = array<i64: 1>, scalar_prefetch = 0 : i64, scratch_operands = 0 : i64, tpu.core_type = #tpu.core_type<tc>, window_params = [{pipeline_mode = #tpu.pipeline_mode<synchronous>, transform_indices = @transform_0, window_bounds = array<i64: 12, 20>}, {pipeline_mode = #tpu.pipeline_mode<synchronous>, transform_indices = @transform_1, window_bounds = array<i64: 128, 12>}, {pipeline_mode = #tpu.pipeline_mode<synchronous>, transform_indices = @transform_2, window_bounds = array<i64: 40, 160>}, {pipeline_mode = #tpu.pipeline_mode<synchronous>, transform_indices = @transform_3, window_bounds = array<i64: 240, 32>}, {pipeline_mode = #tpu.pipeline_mode<synchronous>, transform_indices = @transform_4, window_bounds = array<i64: 12, 4>}]} {
    %0 = tpu.iota {dimensions = array<i32: 0>} : vector<64x12xi32>
    %1 = tpu.iota {dimensions = array<i32: 1>} : vector<64x12xi32>
    %c5_i32 = arith.constant 5 : i32
    %2 = vector.broadcast %c5_i32 : i32 to vector<64x12xi32>
    %3 = arith.muli %1, %2 : vector<64x12xi32>
    %4 = arith.cmpi sge, %0, %3 : vector<64x12xi32>
    %c5_i32_0 = arith.constant 5 : i32
    %5 = vector.broadcast %c5_i32_0 : i32 to vector<64x12xi32>
    %6 = arith.muli %1, %5 : vector<64x12xi32>
    %c5_i32_1 = arith.constant 5 : i32
    %7 = vector.broadcast %c5_i32_1 : i32 to vector<64x12xi32>
    %8 = arith.addi %6, %7 : vector<64x12xi32>
    %9 = arith.cmpi slt, %0, %8 : vector<64x12xi32>
    %10 = arith.andi %4, %9 : vector<64x12xi1>
    %11 = arith.extui %10 : vector<64x12xi1> to vector<64x12xi32>
    %12 = arith.sitofp %11 : vector<64x12xi32> to vector<64x12xf32>
    %13 = tpu.iota {dimensions = array<i32: 1>} : vector<12x64xi32>
    %14 = tpu.iota {dimensions = array<i32: 0>} : vector<12x64xi32>
    %c5_i32_2 = arith.constant 5 : i32
    %15 = vector.broadcast %c5_i32_2 : i32 to vector<12x64xi32>
    %16 = arith.muli %14, %15 : vector<12x64xi32>
    %17 = arith.cmpi sge, %13, %16 : vector<12x64xi32>
    %c5_i32_3 = arith.constant 5 : i32
    %18 = vector.broadcast %c5_i32_3 : i32 to vector<12x64xi32>
    %19 = arith.muli %14, %18 : vector<12x64xi32>
    %c5_i32_4 = arith.constant 5 : i32
    %20 = vector.broadcast %c5_i32_4 : i32 to vector<12x64xi32>
    %21 = arith.addi %19, %20 : vector<12x64xi32>
    %22 = arith.cmpi slt, %13, %21 : vector<12x64xi32>
    %23 = arith.andi %17, %22 : vector<12x64xi1>
    %24 = arith.extui %23 : vector<12x64xi1> to vector<12x64xi32>
    %25 = arith.sitofp %24 : vector<12x64xi32> to vector<12x64xf32>
    %26 = tpu.iota {dimensions = array<i32: 0>} : vector<160x5xi32>
    %27 = tpu.iota {dimensions = array<i32: 1>} : vector<160x5xi32>
    %c32_i32 = arith.constant 32 : i32
    %28 = vector.broadcast %c32_i32 : i32 to vector<160x5xi32>
    %29 = arith.muli %27, %28 : vector<160x5xi32>
    %30 = arith.cmpi sge, %26, %29 : vector<160x5xi32>
    %c32_i32_5 = arith.constant 32 : i32
    %31 = vector.broadcast %c32_i32_5 : i32 to vector<160x5xi32>
    %32 = arith.muli %27, %31 : vector<160x5xi32>
    %c32_i32_6 = arith.constant 32 : i32
    %33 = vector.broadcast %c32_i32_6 : i32 to vector<160x5xi32>
    %34 = arith.addi %32, %33 : vector<160x5xi32>
    %35 = arith.cmpi slt, %26, %34 : vector<160x5xi32>
    %36 = arith.andi %30, %35 : vector<160x5xi1>
    %37 = arith.extui %36 : vector<160x5xi1> to vector<160x5xi32>
    %38 = arith.sitofp %37 : vector<160x5xi32> to vector<160x5xf32>
    %39 = tpu.iota {dimensions = array<i32: 1>} : vector<5x160xi32>
    %40 = tpu.iota {dimensions = array<i32: 0>} : vector<5x160xi32>
    %c32_i32_7 = arith.constant 32 : i32
    %41 = vector.broadcast %c32_i32_7 : i32 to vector<5x160xi32>
    %42 = arith.muli %40, %41 : vector<5x160xi32>
    %43 = arith.cmpi sge, %39, %42 : vector<5x160xi32>
    %c32_i32_8 = arith.constant 32 : i32
    %44 = vector.broadcast %c32_i32_8 : i32 to vector<5x160xi32>
    %45 = arith.muli %40, %44 : vector<5x160xi32>
    %c32_i32_9 = arith.constant 32 : i32
    %46 = vector.broadcast %c32_i32_9 : i32 to vector<5x160xi32>
    %47 = arith.addi %45, %46 : vector<5x160xi32>
    %48 = arith.cmpi slt, %39, %47 : vector<5x160xi32>
    %49 = arith.andi %43, %48 : vector<5x160xi1>
    %50 = arith.extui %49 : vector<5x160xi1> to vector<5x160xi32>
    %51 = arith.sitofp %50 : vector<5x160xi32> to vector<5x160xf32>
    %52 = tpu.iota {dimensions = array<i32: 0>} : vector<12x64xi32>
    %53 = tpu.iota {dimensions = array<i32: 1>} : vector<12x64xi32>
    %c5_i32_10 = arith.constant 5 : i32
    %54 = vector.broadcast %c5_i32_10 : i32 to vector<12x64xi32>
    %55 = arith.muli %52, %54 : vector<12x64xi32>
    %56 = arith.cmpi eq, %53, %55 : vector<12x64xi32>
    %57 = arith.extui %56 : vector<12x64xi1> to vector<12x64xi32>
    %58 = arith.sitofp %57 : vector<12x64xi32> to vector<12x64xf32>
    %c0 = arith.constant 0 : index
    %c0_11 = arith.constant 0 : index
    %59 = vector.load %arg4[%c0, %c0_11] : memref<240x32xbf16, #tpu.memory_space<vmem>>, vector<20x32xbf16>
    %c24 = arith.constant 24 : index
    %c0_12 = arith.constant 0 : index
    %60 = vector.load %arg4[%c24, %c0_12] : memref<240x32xbf16, #tpu.memory_space<vmem>>, vector<1x32xbf16>
    %c32 = arith.constant 32 : index
    %c0_13 = arith.constant 0 : index
    %61 = vector.load %arg4[%c32, %c0_13] : memref<240x32xbf16, #tpu.memory_space<vmem>>, vector<32x32xbf16>
    %c64 = arith.constant 64 : index
    %c0_14 = arith.constant 0 : index
    %62 = vector.load %arg4[%c64, %c0_14] : memref<240x32xbf16, #tpu.memory_space<vmem>>, vector<1x32xbf16>
    %c72 = arith.constant 72 : index
    %c0_15 = arith.constant 0 : index
    %63 = vector.load %arg4[%c72, %c0_15] : memref<240x32xbf16, #tpu.memory_space<vmem>>, vector<160x32xbf16>
    %c232 = arith.constant 232 : index
    %c0_16 = arith.constant 0 : index
    %64 = vector.load %arg4[%c232, %c0_16] : memref<240x32xbf16, #tpu.memory_space<vmem>>, vector<1x32xbf16>
    %c0_17 = arith.constant 0 : index
    %c0_18 = arith.constant 0 : index
    %65 = vector.load %arg3[%c0_17, %c0_18] : memref<40x160xbf16, #tpu.memory_space<vmem>>, vector<32x160xbf16>
    %c32_19 = arith.constant 32 : index
    %c0_20 = arith.constant 0 : index
    %66 = vector.load %arg3[%c32_19, %c0_20] : memref<40x160xbf16, #tpu.memory_space<vmem>>, vector<1x160xbf16>
    %c0_21 = arith.constant 0 : index
    %c0_22 = arith.constant 0 : index
    %67 = vector.load %arg1[%c0_21, %c0_22] : memref<12x20xbf16, #tpu.memory_space<vmem>>, vector<12x20xbf16>
    %cst = arith.constant dense<0.000000e+00> : vector<12x32xf32>
    %68 = tpu.matmul %67, %59, %cst {dimension_numbers = #tpu.dot_dimension_numbers<[1], [0], [0], [1], [0, 0, 1, 1], [], []>} : vector<12x20xbf16>, vector<20x32xbf16>, vector<12x32xf32> -> vector<12x32xf32>
    %69 = arith.extf %60 : vector<1x32xbf16> to vector<1x32xf32>
    %70 = vector.broadcast %69 : vector<1x32xf32> to vector<12x32xf32>
    %71 = arith.addf %68, %70 : vector<12x32xf32>
    %cst_23 = arith.constant 0.000000e+00 : f32
    %72 = vector.broadcast %cst_23 : f32 to vector<12x32xf32>
    %73 = arith.maximumf %71, %72 : vector<12x32xf32>
    %74 = arith.truncf %73 : vector<12x32xf32> to vector<12x32xbf16>
    %cst_24 = arith.constant dense<0.000000e+00> : vector<12x32xf32>
    %75 = tpu.matmul %74, %61, %cst_24 {dimension_numbers = #tpu.dot_dimension_numbers<[1], [0], [0], [1], [0, 0, 1, 1], [], []>} : vector<12x32xbf16>, vector<32x32xbf16>, vector<12x32xf32> -> vector<12x32xf32>
    %76 = arith.extf %62 : vector<1x32xbf16> to vector<1x32xf32>
    %77 = vector.broadcast %76 : vector<1x32xf32> to vector<12x32xf32>
    %78 = arith.addf %75, %77 : vector<12x32xf32>
    %cst_25 = arith.constant 0.000000e+00 : f32
    %79 = vector.broadcast %cst_25 : f32 to vector<12x32xf32>
    %80 = arith.maximumf %78, %79 : vector<12x32xf32>
    %81 = arith.truncf %80 : vector<12x32xf32> to vector<12x32xbf16>
    %cst_26 = arith.constant dense<0.000000e+00> : vector<12x160xf32>
    %82 = tpu.matmul %81, %65, %cst_26 {dimension_numbers = #tpu.dot_dimension_numbers<[1], [0], [0], [1], [0, 0, 1, 1], [], []>} : vector<12x32xbf16>, vector<32x160xbf16>, vector<12x160xf32> -> vector<12x160xf32>
    %c0_27 = arith.constant 0 : index
    %c0_28 = arith.constant 0 : index
    %83 = vector.load %arg2[%c0_27, %c0_28] : memref<128x12xbf16, #tpu.memory_space<vmem>>, vector<128x12xbf16>
    %84 = arith.truncf %82 : vector<12x160xf32> to vector<12x160xbf16>
    %cst_29 = arith.constant dense<0.000000e+00> : vector<128x160xf32>
    %85 = tpu.matmul %83, %84, %cst_29 {dimension_numbers = #tpu.dot_dimension_numbers<[1], [0], [0], [1], [0, 0, 1, 1], [], []>} : vector<128x12xbf16>, vector<12x160xbf16>, vector<128x160xf32> -> vector<128x160xf32>
    %86 = arith.extf %66 : vector<1x160xbf16> to vector<1x160xf32>
    %87 = vector.broadcast %86 : vector<1x160xf32> to vector<128x160xf32>
    %88 = arith.addf %85, %87 : vector<128x160xf32>
    %89 = vector.extract_strided_slice %88 {offsets = [0, 0], sizes = [64, 160], strides = [1, 1]} : vector<128x160xf32> to vector<64x160xf32>
    %90 = vector.extract_strided_slice %88 {offsets = [64, 0], sizes = [64, 160], strides = [1, 1]} : vector<128x160xf32> to vector<64x160xf32>
    %91 = arith.mulf %89, %90 : vector<64x160xf32>
    %92 = arith.truncf %91 : vector<64x160xf32> to vector<64x160xbf16>
    %93 = arith.truncf %38 : vector<160x5xf32> to vector<160x5xbf16>
    %cst_30 = arith.constant dense<0.000000e+00> : vector<64x5xf32>
    %94 = tpu.matmul %92, %93, %cst_30 {dimension_numbers = #tpu.dot_dimension_numbers<[1], [0], [0], [1], [0, 0, 1, 1], [], []>} : vector<64x160xbf16>, vector<160x5xbf16>, vector<64x5xf32> -> vector<64x5xf32>
    %c63_i32 = arith.constant 63 : i32
    %95 = tpu.dynamic_rotate %94 by %c63_i32 dim 0 : vector<64x5xf32>, i32 -> vector<64x5xf32>
    %96 = arith.maximumf %94, %95 : vector<64x5xf32>
    %c62_i32 = arith.constant 62 : i32
    %97 = tpu.dynamic_rotate %94 by %c62_i32 dim 0 : vector<64x5xf32>, i32 -> vector<64x5xf32>
    %98 = arith.maximumf %96, %97 : vector<64x5xf32>
    %c61_i32 = arith.constant 61 : i32
    %99 = tpu.dynamic_rotate %94 by %c61_i32 dim 0 : vector<64x5xf32>, i32 -> vector<64x5xf32>
    %100 = arith.maximumf %98, %99 : vector<64x5xf32>
    %c60_i32 = arith.constant 60 : i32
    %101 = tpu.dynamic_rotate %94 by %c60_i32 dim 0 : vector<64x5xf32>, i32 -> vector<64x5xf32>
    %102 = arith.maximumf %100, %101 : vector<64x5xf32>
    %103 = arith.truncf %58 : vector<12x64xf32> to vector<12x64xbf16>
    %104 = arith.truncf %102 : vector<64x5xf32> to vector<64x5xbf16>
    %cst_31 = arith.constant dense<0.000000e+00> : vector<12x5xf32>
    %105 = tpu.matmul %103, %104, %cst_31 {dimension_numbers = #tpu.dot_dimension_numbers<[1], [0], [0], [1], [0, 0, 1, 1], [], []>} : vector<12x64xbf16>, vector<64x5xbf16>, vector<12x5xf32> -> vector<12x5xf32>
    %106 = arith.truncf %12 : vector<64x12xf32> to vector<64x12xbf16>
    %107 = arith.truncf %105 : vector<12x5xf32> to vector<12x5xbf16>
    %cst_32 = arith.constant dense<0.000000e+00> : vector<64x5xf32>
    %108 = tpu.matmul %106, %107, %cst_32 {dimension_numbers = #tpu.dot_dimension_numbers<[1], [0], [0], [1], [0, 0, 1, 1], [], []>} : vector<64x12xbf16>, vector<12x5xbf16>, vector<64x5xf32> -> vector<64x5xf32>
    %109 = arith.subf %94, %108 : vector<64x5xf32>
    %110 = math.exp %109 : vector<64x5xf32>
    %111 = arith.truncf %25 : vector<12x64xf32> to vector<12x64xbf16>
    %112 = arith.truncf %110 : vector<64x5xf32> to vector<64x5xbf16>
    %cst_33 = arith.constant dense<0.000000e+00> : vector<12x5xf32>
    %113 = tpu.matmul %111, %112, %cst_33 {dimension_numbers = #tpu.dot_dimension_numbers<[1], [0], [0], [1], [0, 0, 1, 1], [], []>} : vector<12x64xbf16>, vector<64x5xbf16>, vector<12x5xf32> -> vector<12x5xf32>
    %114 = tpu.reciprocal %113 {approx = true} : vector<12x5xf32> -> vector<12x5xf32>
    %115 = arith.truncf %12 : vector<64x12xf32> to vector<64x12xbf16>
    %116 = arith.truncf %114 : vector<12x5xf32> to vector<12x5xbf16>
    %cst_34 = arith.constant dense<0.000000e+00> : vector<64x5xf32>
    %117 = tpu.matmul %115, %116, %cst_34 {dimension_numbers = #tpu.dot_dimension_numbers<[1], [0], [0], [1], [0, 0, 1, 1], [], []>} : vector<64x12xbf16>, vector<12x5xbf16>, vector<64x5xf32> -> vector<64x5xf32>
    %118 = arith.mulf %110, %117 : vector<64x5xf32>
    %119 = arith.truncf %118 : vector<64x5xf32> to vector<64x5xbf16>
    %120 = arith.truncf %51 : vector<5x160xf32> to vector<5x160xbf16>
    %cst_35 = arith.constant dense<0.000000e+00> : vector<64x160xf32>
    %121 = tpu.matmul %119, %120, %cst_35 {dimension_numbers = #tpu.dot_dimension_numbers<[1], [0], [0], [1], [0, 0, 1, 1], [], []>} : vector<64x5xbf16>, vector<5x160xbf16>, vector<64x160xf32> -> vector<64x160xf32>
    %122 = arith.mulf %121, %90 : vector<64x160xf32>
    %123 = arith.truncf %25 : vector<12x64xf32> to vector<12x64xbf16>
    %124 = arith.truncf %122 : vector<64x160xf32> to vector<64x160xbf16>
    %cst_36 = arith.constant dense<0.000000e+00> : vector<12x160xf32>
    %125 = tpu.matmul %123, %124, %cst_36 {dimension_numbers = #tpu.dot_dimension_numbers<[1], [0], [0], [1], [0, 0, 1, 1], [], []>} : vector<12x64xbf16>, vector<64x160xbf16>, vector<12x160xf32> -> vector<12x160xf32>
    %126 = arith.truncf %125 : vector<12x160xf32> to vector<12x160xbf16>
    %cst_37 = arith.constant dense<0.000000e+00> : vector<12x32xf32>
    %127 = tpu.matmul %126, %63, %cst_37 {dimension_numbers = #tpu.dot_dimension_numbers<[1], [0], [0], [1], [0, 0, 1, 1], [], []>} : vector<12x160xbf16>, vector<160x32xbf16>, vector<12x32xf32> -> vector<12x32xf32>
    %128 = arith.extf %64 : vector<1x32xbf16> to vector<1x32xf32>
    %129 = vector.broadcast %128 : vector<1x32xf32> to vector<12x32xf32>
    %130 = arith.addf %127, %129 : vector<12x32xf32>
    %131 = vector.extract_strided_slice %130 {offsets = [0, 0], sizes = [12, 4], strides = [1, 1]} : vector<12x32xf32> to vector<12x4xf32>
    %c0_38 = arith.constant 0 : index
    %c0_39 = arith.constant 0 : index
    %132 = vector.load %arg5[%c0_38, %c0_39] : memref<12x4xf32, #tpu.memory_space<vmem>>, vector<12x4xf32>
    tpu.vector_store %arg5[%c0_38, %c0_39], %131 {strides = array<i32>} : memref<12x4xf32, #tpu.memory_space<vmem>>, vector<12x4xf32>,
    return
  }
  func.func @transform_0(%arg0: i32) -> (i32, i32) {
    %c0_i32 = arith.constant 0 : i32
    %c0_i32_0 = arith.constant 0 : i32
    %c0_i32_1 = arith.constant 0 : i32
    return %c0_i32, %c0_i32_0 : i32, i32
  }
  func.func @transform_1(%arg0: i32) -> (i32, i32) {
    %c0_i32 = arith.constant 0 : i32
    %c0_i32_0 = arith.constant 0 : i32
    %c0_i32_1 = arith.constant 0 : i32
    return %c0_i32, %c0_i32_0 : i32, i32
  }
  func.func @transform_2(%arg0: i32) -> (i32, i32) {
    %c0_i32 = arith.constant 0 : i32
    %c0_i32_0 = arith.constant 0 : i32
    %c0_i32_1 = arith.constant 0 : i32
    return %c0_i32, %c0_i32_0 : i32, i32
  }
  func.func @transform_3(%arg0: i32) -> (i32, i32) {
    %c0_i32 = arith.constant 0 : i32
    %c0_i32_0 = arith.constant 0 : i32
    %c0_i32_1 = arith.constant 0 : i32
    return %c0_i32, %c0_i32_0 : i32, i32
  }
  func.func @transform_4(%arg0: i32) -> (i32, i32) {
    %c0_i32 = arith.constant 0 : i32
    %c0_i32_0 = arith.constant 0 : i32
    %c0_i32_1 = arith.constant 0 : i32
    return %c0_i32, %c0_i32_0 : i32, i32
  }
}

</mosaic_0001>

<bundles_post_ra>
// kernel: network_forward.1
= control target key start
LH: loop header
LB: loop body
LE: loop exit
PB: predicated region body
PF: predicated region fallthrough
CT: control target
= control target key end

     0   :  { %vm2428_vm0 = vcmask 1041408   ;;  %v2431_v0 = vmov 0.0   ;;  %vm1711_vm1 = vmmov 0   ;;  %vm206_vm2 = vcmask 162816   ;;  %s2423_s3 = inlined_call_operand.vmem [shape: bf16[240,32], index: 3, kind: input, shape index: {}]   ;;  %s2424_s0 = inlined_call_operand.vmem [shape: bf16[12,20], index: 0, kind: input, shape index: {}]   ;;  %s2425_s2 = inlined_call_operand.vmem [shape: bf16[40,160], index: 2, kind: input, shape index: {}]   ;;  %s2426_s1 = inlined_call_operand.vmem [shape: bf16[128,12], index: 1, kind: input, shape index: {}]   ;;  %s2427_s4 = inlined_call_operand.vmem [shape: f32[12,4], index: 4, kind: output, shape index: {}]  }
   0x1   :  { %1594 = vmatprep.subr.bf16.mxu0 %v2431_v0  ;;  %v1661_v1 = vld [vmem:[%s2423_s3 + $0x8] ss:$0 sps:$4 sm:$0x33]   ;;  %1602 = vmatprep.subr.bf16.mxu1 %v2431_v0  ;;  %v1662_v3 = vld [vmem:[%s2423_s3] sm:$0xff]   ;;  %v1664_v5 = vld [vmem:[%s2423_s3 + $0x18] sm:$0xff]   ;;  %v18_v7 = vlaneseq  ;;  %vm2435_vm3 = vcmask 261120  }
   0x2   :  { %v212_v2 = vsel %vm2428_vm0, %v1661_v1, 0  ;;  %1598 = vmatprep.mubr.msk.bf16.mxu0 %vm1711_vm1, %v2431_v0  ;;  %1606 = vmatprep.mubr.msk.bf16.mxu1 %vm1711_vm1, %v2431_v0  ;;  %v1663_v4 = vld [vmem:[%s2424_s0] sm:$0x3f]   ;;  %v1665_v6 = vld [vmem:[%s2423_s3 + $0x10] sm:$0xff]   ;;  %v153_v9 = vld [vmem:[%s2423_s3 + $0xc] sm:$0x1] }
   0x3   :  { %1595 = vmatpush3.bf16.msra.mxu0 %v212_v2  ;;  %1603 = vmatpush3.bf16.msra.mxu1 %v1664_v5  ;;  %v1765_v8 = vshrl.u32 %v18_v7, 7  ;;  %v187_v10 = vunpack.c.l.bf16 %v153_v9  ;;  %v1668_v22 = vld [vmem:[%s2425_s2 + $0x14] ss:$8 sps:$4 sm:$0xff]   ;;  %v1666_v23 = vld [vmem:[%s2425_s2 + $0x10] ss:$8 sps:$4 sm:$0xff]   ;;  %v2429_v26 = vmov 0  }
   0x4   :  { %1596 = vmatprep.subr.bf16.mxu0 %v2431_v0  ;;  %1604 = vmatprep.subr.bf16.mxu1 %v2431_v0  ;;  %v1671_v24 = vld [vmem:[%s2425_s2 + $0x4] ss:$8 sps:$4 sm:$0xff]   ;;  %v1669_v25 = vld [vmem:[%s2425_s2] ss:$8 sps:$4 sm:$0xff]   ;;  %vm482_vm4 = vcmask 1045504   ;;  %vm457_vm5 = vcmask 97280  }
   0x5   :  { %v1771_v11 = vsub.s32 0, %v1765_v8  ;;  %v158_v27 = vld [vmem:[%s2423_s3 + $0x20] sm:$0x1]  ;;  %v1673_v47 = vld [vmem:[%s2426_s1 + $0x8] sm:$0xff]   ;;  %v1674_v48 = vld [vmem:[%s2426_s1 + $0x10] sm:$0xff]   ;;  %v1840_v54 = vand.u32 127, %v18_v7 }
   0x6   :  { %v258_v28 = vunpack.c.l.bf16 %v158_v27  ;;  %v1672_v46 = vld [vmem:[%s2426_s1] sm:$0xff]   ;;  %v1675_v49 = vld [vmem:[%s2426_s1 + $0x18] sm:$0xff]   ;;  %v1677_v51 = vld [vmem:[%s2426_s1 + $0x28] sm:$0xff]   ;;  %v71_v56 = vadd.s32 112, %v1765_v8  ;;  %v72_v57 = vadd.s32 120, %v1765_v8  ;;  %v69_v59 = vadd.s32 96, %v1765_v8 }
   0x7   :  { %1597 = vmatpush3.bf16.msra.mxu0 %v1662_v3  ;;  %1605 = vmatpush3.bf16.msra.mxu1 %v1665_v6  ;;  %2437 = vst [vmem:[#allocation2_spill] sm:$0xff] %v1771_v11  ;;  %v191_v12 = vrot.slane %v187_v10, %v1771_v11  ;;  %v1676_v50 = vld [vmem:[%s2426_s1 + $0x20] sm:$0xff]   ;;  %v1678_v52 = vld [vmem:[%s2426_s1 + $0x30] sm:$0xff]   ;;  %v1679_v53 = vld [vmem:[%s2426_s1 + $0x38] sm:$0xff]   ;;  %v1843_v55 = vmul.u32 32, %v1840_v54  ;;  %v70_v60 = vadd.s32 104, %v1765_v8 }
   0x8   :  { %358 = vmatprep.subr.bf16.mxu0 %v1668_v22  ;;  %v262_v29 = vrot.slane %v258_v28, %v1771_v11  ;;  %v1713_v61 = vmov 1.0|1.0   ;;  %v67_v62 = vadd.s32 80, %v1765_v8  ;;  %v68_v63 = vadd.s32 88, %v1765_v8 }
   0x9   :  { %v1848_v58 = vadd.s32 32, %v1843_v55  ;;  %vm92_vm6 = vcmp.ge.s32.totalorder %v71_v56, %v1843_v55  ;;  %vm93_vm7 = vcmp.ge.s32.totalorder %v72_v57, %v1843_v55  ;;  %vm90_vm13 = vcmp.ge.s32.totalorder %v69_v59, %v1843_v55 }
   0xa   :  { %1599 = vmatmul.mubr.msk.bf16.vlgmr.msra.gmra.mxu0 %vm206_vm2, %v1663_v4  ;;  %vm91_vm14 = vcmp.ge.s32.totalorder %v70_v60, %v1843_v55  ;;  %v65_v1 = vadd.s32 64, %v1765_v8  ;;  %v66_v2 = vadd.s32 72, %v1765_v8  ;;  %v1879_v3 = vadd.s32 48, %v1765_v8 }
   0xb   :  { %359 = vmatpush1.bf16.msra.mxu0 %v1666_v23  ;;  %378 = vmatprep.mubr.bf16.mxu0 %v2429_v26  ;;  %vm113_vm8 = vcmp.lt.s32.totalorder %v71_v56, %v1848_v58  ;;  %vm114_vm9 = vcmp.lt.s32.totalorder %v72_v57, %v1848_v58  ;;  %vm111_vm15 = vcmp.lt.s32.totalorder %v69_v59, %v1848_v58  ;;  %v1882_v4 = vadd.s32 56, %v1765_v8 }
   0xc   :  { %360 = vmatprep.subr.bf16.mxu0 %v1671_v24  ;;  %vm133_vm10 = vmand %vm92_vm6, %vm113_vm8  ;;  %vm112_vm2 = vcmp.lt.s32.totalorder %v70_v60, %v1848_v58  ;;  %v1895_v5 = vadd.s32 32, %v1765_v8  ;;  %v1898_v6 = vadd.s32 40, %v1765_v8  ;;  %v1911_v7 = vadd.s32 16, %v1765_v8 }
   0xd   :  { %vm134_vm11 = vmand %vm93_vm7, %vm114_vm9  ;;  %vm88_vm9 = vcmp.ge.s32.totalorder %v67_v62, %v1843_v55  ;;  %v1914_v9 = vadd.s32 24, %v1765_v8  ;;  %v1927_v10 = vadd.s32 8, %v1765_v8 }
   0xe   :  { %vm1504_vm12 = vmpackc.low %vm134_vm11, %vm133_vm10  ;;  %vm89_vm10 = vcmp.ge.s32.totalorder %v68_v63, %v1843_v55  ;;  %vm109_vm11 = vcmp.lt.s32.totalorder %v67_v62, %v1848_v58 }
   0xf   :  { %361 = vmatpush1.bf16.msra.mxu0 %v1669_v25  ;;  %vm131_vm6 = vmand %vm90_vm13, %vm111_vm15  ;;  %vm86_vm15 = vcmp.ge.s32.totalorder %v65_v1, %v1843_v55 }
  0x10   :  { %688 = vmatprep.subr.bf16.mxu0 %v2429_v26  ;;  %vm132_vm7 = vmand %vm91_vm14, %vm112_vm2  ;;  %vm87_vm2 = vcmp.ge.s32.totalorder %v66_v2, %v1843_v55 }
  0x11   :  { %vm1506_vm8 = vmpackc.low %vm132_vm7, %vm131_vm6  ;;  %vm107_vm6 = vcmp.lt.s32.totalorder %v65_v1, %v1848_v58  ;;  %vm108_vm7 = vcmp.lt.s32.totalorder %v66_v2, %v1848_v58 }
  0x12   :  { %vm129_vm0 = vmand %vm88_vm9, %vm109_vm11  ;;  %vm85_vm11 = vcmp.ge.s32.totalorder %v1882_v4, %v1843_v55 }
  0x13   :  { %vm128_vm9 = vmand %vm87_vm2, %vm108_vm7  ;;  %vm83_vm7 = vcmp.ge.s32.totalorder %v1898_v6, %v1843_v55 }
  0xca   :  { %v248_v13 = vpop.f32.mrf.mxu0 }
  0xcb   :  { %v249_v15 = vadd.f32 %v248_v13, %v191_v12  ;;  %v76_v13 = vadd.s32 152, %v1765_v8 }
  0xcc   :  { %v1600_v14 = vpop.f32.mrf.mxu0 }
  0xcd   :  { %v255_v19 = vmax.f32 %v249_v15, 0.0  ;;  %v73_v14 = vadd.s32 128, %v1765_v8  ;;  %v74_v15 = vadd.s32 136, %v1765_v8 }
  0xce   :  { %v251_v16 = vpop.f32.mrf.mxu0 }
  0xcf   :  { %v252_v17 = vadd.f32 %v251_v16, %v191_v12  ;;  %v75_v12 = vadd.s32 144, %v1765_v8 }
  0xd0   :  { %v1601_v18 = vpop.f32.mrf.mxu0 }
  0xd1   :  { %v256_v20 = vmax.f32 %v252_v17, 0.0 }
  0xd3   :  { %v257_v21 = vpack.c.bf16 %v256_v20, %v255_v19 }
  0xd5   :  { %1607 = vmatmul.mubr.msk.bf16.vlgmr.msra.gmra.mxu1 %vm2435_vm3, %v257_v21 }
  0xd6   :  { %521 = vmatprep.mubr.bf16.mxu1 %v2429_v26 }
 0x195   :  { %v313_v30 = vpop.f32.mrf.mxu1 }
 0x196   :  { %v314_v32 = vadd.f32 %v313_v30, %v262_v29 }
 0x197   :  { %v1608_v31 = vpop.f32.mrf.mxu1 }
 0x198   :  { %v320_v36 = vmax.f32 %v314_v32, 0.0  ;;  %v184_v31 = vld [vmem:[%s2425_s2 + $0x20] sm:$0x11] }
 0x199   :  { %v316_v33 = vpop.f32.mrf.mxu1 }
 0x19a   :  { %v317_v34 = vadd.f32 %v316_v33, %v262_v29 }
 0x19b   :  { %v1609_v35 = vpop.f32.mrf.mxu1 }
 0x19c   :  { %v321_v37 = vmax.f32 %v317_v34, 0.0  ;;  %v407_v34 = vunpack.c.l.bf16 %v184_v31  ;;  %v408_v35 = vunpack.c.h.bf16 %v184_v31 }
 0x19e   :  { %v322_v38 = vpack.c.bf16 %v321_v37, %v320_v36 }
 0x1a0   :  { %1466 = vmatmul.mubr.msk.bf16.vlgmr.msra.gmra.mxu0 %vm2435_vm3, %v322_v38  ;;  %v1971_v38 = vrot.slane %v407_v34, %v1771_v11 }
 0x1a1   :  { %1505 = vmatpush1.bf16.msk.msra.mxu0 %vm1504_vm12, %v1713_v61  ;;  %vm110_vm12 = vcmp.lt.s32.totalorder %v68_v63, %v1848_v58 }
 0x1a2   :  { %690 = vmatprep.subr.bf16.mxu0 %v2429_v26  ;;  %vm130_vm13 = vmand %vm89_vm10, %vm110_vm12  ;;  %vm84_vm10 = vcmp.ge.s32.totalorder %v1879_v3, %v1843_v55  ;;  %vm105_vm12 = vcmp.lt.s32.totalorder %v1879_v3, %v1848_v58 }
 0x1a3   :  { %vm1508_vm14 = vmpackc.low %vm130_vm13, %vm129_vm0  ;;  %vm106_vm13 = vcmp.lt.s32.totalorder %v1882_v4, %v1848_v58 }
 0x1a5   :  { %1507 = vmatpush1.bf16.msk.msra.mxu0 %vm1506_vm8, %v1713_v61  ;;  %vm127_vm8 = vmand %vm86_vm15, %vm107_vm6  ;;  %vm82_vm6 = vcmp.ge.s32.totalorder %v1895_v5, %v1843_v55 }
 0x1a6   :  { %692 = vmatprep.subr.bf16.mxu0 %v2429_v26  ;;  %vm1510_vm0 = vmpackc.low %vm128_vm9, %vm127_vm8  ;;  %vm103_vm8 = vcmp.lt.s32.totalorder %v1895_v5, %v1848_v58  ;;  %vm104_vm9 = vcmp.lt.s32.totalorder %v1898_v6, %v1848_v58 }
 0x1a7   :  { %vm126_vm15 = vmand %vm85_vm11, %vm106_vm13  ;;  %vm81_vm13 = vcmp.ge.s32.totalorder %v1914_v9, %v1843_v55 }
 0x1a9   :  { %1509 = vmatpush1.bf16.msk.msra.mxu0 %vm1508_vm14, %v1713_v61  ;;  %vm125_vm14 = vmand %vm84_vm10, %vm105_vm12  ;;  %vm80_vm12 = vcmp.ge.s32.totalorder %v1911_v7, %v1843_v55 }
 0x1aa   :  { %694 = vmatprep.subr.bf16.mxu0 %v2429_v26  ;;  %vm1512_vm2 = vmpackc.low %vm126_vm15, %vm125_vm14  ;;  %vm101_vm14 = vcmp.lt.s32.totalorder %v1911_v7, %v1848_v58  ;;  %vm102_vm15 = vcmp.lt.s32.totalorder %v1914_v9, %v1848_v58 }
 0x1ab   :  { %vm124_vm10 = vmand %vm83_vm7, %vm104_vm9  ;;  %vm79_vm9 = vcmp.ge.s32.totalorder %v1927_v10, %v1843_v55 }
 0x1ad   :  { %1511 = vmatpush1.bf16.msk.msra.mxu0 %vm1510_vm0, %v1713_v61  ;;  %vm123_vm0 = vmand %vm82_vm6, %vm103_vm8  ;;  %vm78_vm8 = vcmp.ge.s32.totalorder %v1765_v8, %v1843_v55 }
 0x1ae   :  { %696 = vmatprep.subr.bf16.mxu0 %v2429_v26  ;;  %vm1514_vm11 = vmpackc.low %vm124_vm10, %vm123_vm0  ;;  %vm99_vm0 = vcmp.lt.s32.totalorder %v1765_v8, %v1848_v58  ;;  %vm100_vm10 = vcmp.lt.s32.totalorder %v1927_v10, %v1848_v58 }
 0x1af   :  { %vm122_vm6 = vmand %vm81_vm13, %vm102_vm15  ;;  %vm97_vm15 = vcmp.ge.s32.totalorder %v76_v13, %v1843_v55 }
 0x1b1   :  { %1513 = vmatpush1.bf16.msk.msra.mxu0 %vm1512_vm2, %v1713_v61  ;;  %vm121_vm2 = vmand %vm80_vm12, %vm101_vm14  ;;  %vm96_vm14 = vcmp.ge.s32.totalorder %v75_v12, %v1843_v55 }
 0x1b2   :  { %698 = vmatprep.subr.bf16.mxu0 %v2429_v26  ;;  %vm1516_vm7 = vmpackc.low %vm122_vm6, %vm121_vm2  ;;  %vm117_vm2 = vcmp.lt.s32.totalorder %v75_v12, %v1848_v58  ;;  %vm118_vm6 = vcmp.lt.s32.totalorder %v76_v13, %v1848_v58 }
 0x1b3   :  { %vm120_vm12 = vmand %vm79_vm9, %vm100_vm10  ;;  %vm95_vm10 = vcmp.ge.s32.totalorder %v74_v15, %v1843_v55 }
 0x1b5   :  { %1515 = vmatpush1.bf16.msk.msra.mxu0 %vm1514_vm11, %v1713_v61  ;;  %vm119_vm11 = vmand %vm78_vm8, %vm99_vm0  ;;  %vm94_vm0 = vcmp.ge.s32.totalorder %v73_v14, %v1843_v55 }
 0x1b6   :  { %700 = vmatprep.subr.bf16.mxu0 %v2429_v26  ;;  %vm1518_vm13 = vmpackc.low %vm120_vm12, %vm119_vm11  ;;  %vm115_vm11 = vcmp.lt.s32.totalorder %v73_v14, %v1848_v58  ;;  %vm116_vm12 = vcmp.lt.s32.totalorder %v74_v15, %v1848_v58 }
 0x1b7   :  { %vm138_vm8 = vmand %vm97_vm15, %vm118_vm6  ;;  %vm811_vm6 = vcmp.lt.s32.totalorder %v1765_v8, 5 }
 0x1b9   :  { %1517 = vmatpush1.bf16.msk.msra.mxu0 %vm1516_vm7, %v1713_v61  ;;  %vm137_vm7 = vmand %vm96_vm14, %vm117_vm2  ;;  %vm786_vm2 = vcmp.lt.s32.totalorder %v1765_v8, 6 }
 0x1ba   :  { %702 = vmatprep.subr.bf16.mxu0 %v2429_v26  ;;  %vm1520_vm9 = vmpackc.low %vm138_vm8, %vm137_vm7  ;;  %vm836_vm7 = vcmp.lt.s32.totalorder %v1765_v8, 4 }
 0x1bb   :  { %vm136_vm14 = vmand %vm95_vm10, %vm116_vm12 }
 0x1bd   :  { %1519 = vmatpush1.bf16.msk.msra.mxu0 %vm1518_vm13, %v1713_v61  ;;  %vm135_vm13 = vmand %vm94_vm0, %vm115_vm11  ;;  %vm2436_vm0 = vcmask 523264  }
 0x1be   :  { %716 = vmatprep.subr.bf16.mxu0 %v2429_v26  ;;  %vm1522_vm15 = vmpackc.low %vm136_vm14, %vm135_vm13 }
 0x1c1   :  { %1521 = vmatpush2.bf16.msk.msra.mxu0 %vm1520_vm9, %v1713_v61 }
 0x1c2   :  { %718 = vmatprep.subr.bf16.mxu0 %v2429_v26 }
 0x1c5   :  { %1523 = vmatpush2.bf16.msk.msra.mxu0 %vm1522_vm15, %v1713_v61 }
 0x1c6   :  { %1610 = vmatprep.subr.bf16.mxu0 %v2431_v0 }
 0x260   :  { %v380_v39 = vpop.f32.mrf.mxu0 }
 0x262   :  { %v382_v40 = vpop.f32.mrf.mxu0 }
 0x264   :  { %v384_v41 = vpop.f32.mrf.mxu0 }
 0x265   :  { %v405_v42 = vpack.c.bf16 %v384_v41, %v380_v39  ;;  %v1974_v39 = vrot.slane %v408_v35, %v1771_v11 }
 0x266   :  { %v386_v43 = vpop.f32.mrf.mxu0 }
 0x267   :  { %v406_v44 = vpack.c.bf16 %v386_v43, %v382_v40  ;;  %v484_v45 = vsel %vm482_vm4, %v405_v42, 0 }
 0x269   :  { %1475 = vmatprep.subr.msk.bf16.mxu1 %vm482_vm4, %v406_v44 }
 0x26a   :  { %504 = vmatpush1.bf16.msra.mxu1 %v484_v45 }
 0x26b   :  { %1632 = vmatprep.subr.bf16.mxu1 %v2431_v0 }
 0x26d   :  { %1476 = vmatmul.mubr.msk.bf16.vlgmr.msra.gmra.mxu1 %vm457_vm5, %v1672_v46 }
 0x26e   :  { %531 = vmatprep.mubr.bf16.mxu1 %v2429_v26 }
 0x275   :  { %1477 = vmatmul.mubr.msk.bf16.gmra.mxu1 %vm457_vm5, %v1673_v47 }
 0x276   :  { %541 = vmatprep.mubr.bf16.mxu1 %v2429_v26 }
 0x27d   :  { %1478 = vmatmul.mubr.msk.bf16.gmra.mxu1 %vm457_vm5, %v1674_v48 }
 0x27e   :  { %551 = vmatprep.mubr.bf16.mxu1 %v2429_v26 }
 0x285   :  { %1479 = vmatmul.mubr.msk.bf16.gmra.mxu1 %vm457_vm5, %v1675_v49 }
 0x286   :  { %561 = vmatprep.mubr.bf16.mxu1 %v2429_v26 }
 0x28d   :  { %1480 = vmatmul.mubr.msk.bf16.gmra.mxu1 %vm457_vm5, %v1676_v50 }
 0x28e   :  { %571 = vmatprep.mubr.bf16.mxu1 %v2429_v26 }
 0x295   :  { %1481 = vmatmul.mubr.msk.bf16.gmra.mxu1 %vm457_vm5, %v1677_v51 }
 0x296   :  { %581 = vmatprep.mubr.bf16.mxu1 %v2429_v26 }
 0x29d   :  { %1482 = vmatmul.mubr.msk.bf16.gmra.mxu1 %vm457_vm5, %v1678_v52 }
 0x29e   :  { %591 = vmatprep.mubr.bf16.mxu1 %v2429_v26 }
 0x2a5   :  { %1483 = vmatmul.mubr.msk.bf16.gmra.mxu1 %vm457_vm5, %v1679_v53 }
 0x2a6   :  { %1640 = vmatprep.mubr.msk.bf16.mxu1 %vm1711_vm1, %v2431_v0 }
 0x32d   :  { %v523_v16 = vpop.f32.mrf.mxu1 }
 0x32e   :  { %v524_v49 = vadd.f32 %v523_v16, %v1971_v38 }
 0x32f   :  { %v525_v17 = vpop.f32.mrf.mxu1 }
 0x330   :  { %v526_v46 = vadd.f32 %v525_v17, %v1974_v39 }
 0x331   :  { %v527_v18 = vpop.f32.mrf.mxu1 }
 0x332   :  { %v528_v43 = vadd.f32 %v527_v18, %v1971_v38 }
 0x333   :  { %v529_v19 = vpop.f32.mrf.mxu1 }
 0x334   :  { %v530_v47 = vadd.f32 %v529_v19, %v1974_v39 }
 0x335   :  { %v533_v20 = vpop.f32.mrf.mxu1 }
 0x336   :  { %v534_v14 = vadd.f32 %v533_v20, %v1971_v38 }
 0x337   :  { %v535_v21 = vpop.f32.mrf.mxu1 }
 0x338   :  { %v536_v2 = vadd.f32 %v535_v21, %v1974_v39 }
 0x339   :  { %v537_v22 = vpop.f32.mrf.mxu1 }
 0x33a   :  { %v538_v62 = vadd.f32 %v537_v22, %v1971_v38 }
 0x33b   :  { %v539_v23 = vpop.f32.mrf.mxu1 }
 0x33c   :  { %v540_v12 = vadd.f32 %v539_v23, %v1974_v39 }
 0x33d   :  { %v1957_v24 = vpop.f32.mrf.mxu1 }
 0x33f   :  { %v545_v25 = vpop.f32.mrf.mxu1 }
 0x341   :  { %v547_v27 = vpop.f32.mrf.mxu1 }
 0x342   :  { %v548_v20 = vadd.f32 %v547_v27, %v1971_v38 }
 0x343   :  { %v549_v28 = vpop.f32.mrf.mxu1 }
 0x345   :  { %v1959_v29 = vpop.f32.mrf.mxu1 }
 0x347   :  { %v1961_v30 = vpop.f32.mrf.mxu1 }
 0x349   :  { %v1966_v32 = vpop.f32.mrf.mxu1 }
 0x34b   :  { %v1968_v33 = vpop.f32.mrf.mxu1 }
 0x34d   :  { %v563_v36 = vpop.f32.mrf.mxu1 }
 0x34e   :  { %v1984_v44 = vadd.f32 %v563_v36, %v1971_v38 }
 0x34f   :  { %v565_v37 = vpop.f32.mrf.mxu1 }
 0x350   :  { %v1977_v41 = vadd.f32 %v565_v37, %v1974_v39  ;;  %2438 = vst [vmem:[#allocation3_spill] sm:$0xff] %v1984_v44  ;;  %v602_v55 = vmul.f32 %v1984_v44, %v524_v49 }
 0x351   :  { %v567_v40 = vpop.f32.mrf.mxu1 }
 0x352   :  { %v1980_v42 = vadd.f32 %v567_v40, %v1971_v38  ;;  %v603_v52 = vmul.f32 %v1977_v41, %v526_v46  ;;  %v546_v40 = vadd.f32 %v545_v25, %v1974_v39  ;;  %v544_v46 = vadd.f32 %v1957_v24, %v1971_v38 }
 0x353   :  { %v569_v45 = vpop.f32.mrf.mxu1  ;;  %v558_v24 = vadd.f32 %v1966_v32, %v1971_v38 }
 0x354   :  { %v1989_v48 = vadd.f32 %v569_v45, %v1974_v39  ;;  %v604_v50 = vmul.f32 %v1980_v42, %v528_v43  ;;  %v550_v43 = vadd.f32 %v549_v28, %v1974_v39 }
 0x355   :  { %v573_v51 = vpop.f32.mrf.mxu1 }
 0x356   :  { %v605_v53 = vmul.f32 %v1989_v48, %v530_v47  ;;  %v618_v58 = vpack.c.bf16 %v604_v50, %v602_v55  ;;  %v2005_v63 = vadd.f32 %v573_v51, %v1971_v38 }
 0x357   :  { %v575_v56 = vpop.f32.mrf.mxu1 }
 0x358   :  { %v619_v57 = vpack.c.bf16 %v605_v53, %v603_v52  ;;  %v1997_v60 = vadd.f32 %v575_v56, %v1974_v39  ;;  %v606_v19 = vmul.f32 %v2005_v63, %v534_v14 }
 0x359   :  { %v577_v59 = vpop.f32.mrf.mxu1 }
 0x35a   :  { %v2000_v61 = vadd.f32 %v577_v59, %v1971_v38  ;;  %1524 = vmatprep.mubr.msk.bf16.mxu0 %vm2435_vm3, %v619_v57  ;;  %v607_v17 = vmul.f32 %v1997_v60, %v536_v2  ;;  %v556_v59 = vadd.f32 %v1961_v30, %v1974_v39  ;;  %v554_v2 = vadd.f32 %v1959_v29, %v1971_v38 }
 0x35b   :  { %v579_v1 = vpop.f32.mrf.mxu1  ;;  %721 = vmatmul.mubr.bf16.vlgmr.msra.gmra.mxu0 %v618_v58 }
 0x35c   :  { %v2010_v13 = vadd.f32 %v579_v1, %v1974_v39  ;;  %v608_v15 = vmul.f32 %v2000_v61, %v538_v62  ;;  %v560_v62 = vadd.f32 %v1968_v33, %v1974_v39 }
 0x35d   :  { %v583_v16 = vpop.f32.mrf.mxu1 }
 0x35e   :  { %v609_v18 = vmul.f32 %v2010_v13, %v540_v12  ;;  %v620_v21 = vpack.c.bf16 %v608_v15, %v606_v19  ;;  %v2026_v36 = vadd.f32 %v583_v16, %v1971_v38 }
 0x35f   :  { %v585_v22 = vpop.f32.mrf.mxu1 }
 0x360   :  { %v621_v31 = vpack.c.bf16 %v609_v18, %v607_v17  ;;  %v2018_v23 = vadd.f32 %v585_v22, %v1974_v39  ;;  %v610_v51 = vmul.f32 %v2026_v36, %v544_v46 }
 0x361   :  { %v587_v34 = vpop.f32.mrf.mxu1 }
 0x362   :  { %v2021_v35 = vadd.f32 %v587_v34, %v1971_v38  ;;  %1525 = vmatprep.mubr.msk.bf16.mxu0 %vm2435_vm3, %v621_v31  ;;  %v611_v27 = vmul.f32 %v2018_v23, %v546_v40 }
 0x363   :  { %v589_v37 = vpop.f32.mrf.mxu1  ;;  %729 = vmatmul.mubr.bf16.gmra.mxu0 %v620_v21 }
 0x364   :  { %v2031_v45 = vadd.f32 %v589_v37, %v1974_v39  ;;  %v612_v47 = vmul.f32 %v2021_v35, %v548_v20 }
 0x365   :  { %v593_v49 = vpop.f32.mrf.mxu1 }
 0x366   :  { %v613_v50 = vmul.f32 %v2031_v45, %v550_v43  ;;  %v622_v55 = vpack.c.bf16 %v612_v47, %v610_v51  ;;  %v2049_v57 = vadd.f32 %v593_v49, %v1971_v38 }
 0x367   :  { %v595_v52 = vpop.f32.mrf.mxu1 }
 0x368   :  { %v623_v53 = vpack.c.bf16 %v613_v50, %v611_v27  ;;  %v2040_v28 = vadd.f32 %v595_v52, %v1974_v39  ;;  %v614_v15 = vmul.f32 %v2049_v57, %v554_v2 }
 0x369   :  { %v597_v25 = vpop.f32.mrf.mxu1 }
 0x36a   :  { %v2043_v56 = vadd.f32 %v597_v25, %v1971_v38  ;;  %1526 = vmatprep.mubr.msk.bf16.mxu0 %vm2435_vm3, %v623_v53  ;;  %v615_v32 = vmul.f32 %v2040_v28, %v556_v59 }
 0x36b   :  { %v599_v58 = vpop.f32.mrf.mxu1  ;;  %737 = vmatmul.mubr.bf16.gmra.mxu0 %v622_v55 }
 0x36c   :  { %v2056_v1 = vadd.f32 %v599_v58, %v1974_v39  ;;  %v616_v12 = vmul.f32 %v2043_v56, %v558_v24 }
 0x36e   :  { %v617_v14 = vmul.f32 %v2056_v1, %v560_v62  ;;  %v624_v17 = vpack.c.bf16 %v616_v12, %v614_v15 }
 0x370   :  { %v625_v16 = vpack.c.bf16 %v617_v14, %v615_v32 }
 0x372   :  { %1527 = vmatprep.mubr.msk.bf16.mxu0 %vm2435_vm3, %v625_v16 }
 0x373   :  { %745 = vmatmul.mubr.bf16.gmra.mxu0 %v624_v17 }
 0x374   :  { %1618 = vmatprep.mubr.msk.bf16.mxu0 %vm1711_vm1, %v2431_v0  ;;  %vm761_vm1 = vcmp.lt.s32.totalorder %v1765_v8, 7 }
 0x41b   :  { %v2067_v30 = vpop.f32.mrf.mxu0 }
 0x41c   :  { %v753_v40 = vrot.slane %v2067_v30, 1  ;;  %v778_v51 = vrot.slane %v2067_v30, 2 }
 0x41d   :  { %v724_v33 = vpop.f32.mrf.mxu0 }
 0x41f   :  { %v2069_v29 = vpop.f32.mrf.mxu0 }
 0x420   :  { %v754_v21 = vrot.slane %v2069_v29, 1 }
 0x421   :  { %v727_v38 = vpop.f32.mrf.mxu0 }
 0x422   :  { %v2087_v47 = vsel %vm761_vm1, %v753_v40, %v754_v21 }
 0x423   :  { %v2071_v39 = vpop.f32.mrf.mxu0 }
 0x424   :  { %v755_v20 = vrot.slane %v2071_v39, 1  ;;  %v780_v2 = vrot.slane %v2071_v39, 2 }
 0x425   :  { %v732_v18 = vpop.f32.mrf.mxu0 }
 0x426   :  { %v2091_v49 = vsel %vm761_vm1, %v754_v21, %v755_v20 }
 0x427   :  { %v2073_v19 = vpop.f32.mrf.mxu0  ;;  %v771_v15 = vmax.f32 %v2069_v29, %v2091_v49 }
 0x428   :  { %v756_v43 = vrot.slane %v2073_v19, 1  ;;  %v781_v25 = vrot.slane %v2073_v19, 2  ;;  %v806_v18 = vrot.slane %v2073_v19, 3 }
 0x429   :  { %v735_v22 = vpop.f32.mrf.mxu0 }
 0x42a   :  { %v766_v59 = vsel %vm761_vm1, %v755_v20, %v756_v43  ;;  %v791_v20 = vsel %vm786_vm2, %v780_v2, %v781_v25 }
 0x42b   :  { %v2075_v31 = vpop.f32.mrf.mxu0  ;;  %v772_v21 = vmax.f32 %v2071_v39, %v766_v59 }
 0x42c   :  { %v757_v27 = vrot.slane %v2075_v31, 1 }
 0x42d   :  { %v740_v34 = vpop.f32.mrf.mxu0 }
 0x42e   :  { %v765_v16 = vsel %vm761_vm1, %v756_v43, %v757_v27  ;;  %v782_v43 = vrot.slane %v2075_v31, 2 }
 0x42f   :  { %v2080_v37 = vpop.f32.mrf.mxu0  ;;  %v773_v59 = vmax.f32 %v2073_v19, %v765_v16 }
 0x430   :  { %v758_v50 = vrot.slane %v2080_v37, 1  ;;  %v808_v24 = vrot.slane %v2080_v37, 3 }
 0x431   :  { %v743_v46 = vpop.f32.mrf.mxu0 }
 0x432   :  { %v764_v17 = vsel %vm761_vm1, %v757_v27, %v758_v50  ;;  %v783_v46 = vrot.slane %v2080_v37, 2 }
 0x433   :  { %v2099_v55 = vpop.f32.mrf.mxu0 }
 0x434   :  { %v759_v62 = vrot.slane %v2099_v55, 1  ;;  %v784_v38 = vrot.slane %v2099_v55, 2 }
 0x435   :  { %v748_v32 = vpop.f32.mrf.mxu0 }
 0x436   :  { %v763_v33 = vsel %vm761_vm1, %v758_v50, %v759_v62  ;;  %v807_v50 = vrot.slane %v2075_v31, 3  ;;  %v809_v32 = vrot.slane %v2099_v55, 3  ;;  %v788_v12 = vsel %vm786_vm2, %v783_v46, %v784_v38 }
 0x437   :  { %v2121_v22 = vpop.f32.mrf.mxu0  ;;  %v775_v34 = vmax.f32 %v2080_v37, %v763_v33  ;;  %v774_v33 = vmax.f32 %v2075_v31, %v764_v17 }
 0x438   :  { %v760_v49 = vrot.slane %v2121_v22, 1  ;;  %v785_v27 = vrot.slane %v2121_v22, 2  ;;  %v810_v14 = vrot.slane %v2121_v22, 3  ;;  %v835_v16 = vrot.slane %v2121_v22, 4 }
 0x439   :  { %v751_v26 = vpop.f32.mrf.mxu0  ;;  %v800_v17 = vmax.f32 %v775_v34, %v788_v12 }
 0x43a   :  { %v762_v58 = vsel %vm761_vm1, %v759_v62, %v760_v49  ;;  %v769_v0 = vsel %vm761_vm1, %v760_v49, %v753_v40  ;;  %v787_v62 = vsel %vm786_vm2, %v784_v38, %v785_v27  ;;  %v794_v40 = vsel %vm786_vm2, %v785_v27, %v778_v51 }
 0x43b   :  { %v777_v53 = vmax.f32 %v2121_v22, %v769_v0  ;;  %v776_v26 = vmax.f32 %v2099_v55, %v762_v58  ;;  %v789_v49 = vsel %vm786_vm2, %v782_v43, %v783_v46  ;;  %v790_v0 = vsel %vm786_vm2, %v781_v25, %v782_v43 }
 0x43c   :  { %v799_v44 = vmax.f32 %v774_v33, %v789_v49  ;;  %v834_v58 = vrot.slane %v2099_v55, 4  ;;  %v812_v12 = vsel %vm811_vm6, %v809_v32, %v810_v14  ;;  %v2439_v38 = vrot.slane %v2067_v30, 3 }
 0x43d   :  { %v801_v52 = vmax.f32 %v776_v26, %v787_v62  ;;  %v802_v11 = vmax.f32 %v777_v53, %v794_v40  ;;  %v813_v27 = vsel %vm811_vm6, %v808_v24, %v809_v32  ;;  %v798_v33 = vmax.f32 %v773_v59, %v790_v0 }
 0x43e   :  { %v819_v34 = vsel %vm811_vm6, %v810_v14, %v2439_v38  ;;  %v825_v53 = vmax.f32 %v800_v17, %v813_v27  ;;  %v833_v62 = vrot.slane %v2080_v37, 4  ;;  %v837_v25 = vsel %vm836_vm7, %v834_v58, %v835_v16 }
 0x43f   :  { %v826_v46 = vmax.f32 %v801_v52, %v812_v12  ;;  %v827_v26 = vmax.f32 %v802_v11, %v819_v34  ;;  %v2440_v43 = vrot.slane %v2067_v30, 4  ;;  %v814_v14 = vsel %vm811_vm6, %v807_v50, %v808_v24 }
 0x440   :  { %v824_v32 = vmax.f32 %v799_v44, %v814_v14  ;;  %v797_v52 = vmax.f32 %v772_v21, %v791_v20  ;;  %v832_v11 = vrot.slane %v2075_v31, 4  ;;  %v838_v59 = vsel %vm836_vm7, %v833_v62, %v834_v58 }
 0x441   :  { %v844_v40 = vsel %vm836_vm7, %v835_v16, %v2440_v43  ;;  %v851_v49 = vmax.f32 %v826_v46, %v837_v25  ;;  %v815_v17 = vsel %vm811_vm6, %v806_v18, %v807_v50  ;;  %v2441_v0 = vrot.slane %v2069_v29, 2 }
 0x442   :  { %v852_v38 = vmax.f32 %v827_v26, %v844_v40  ;;  %v850_v34 = vmax.f32 %v825_v53, %v838_v59  ;;  %v823_v24 = vmax.f32 %v798_v33, %v815_v17  ;;  %v831_v44 = vrot.slane %v2073_v19, 4 }
 0x443   :  { %v792_v16 = vsel %vm786_vm2, %v2441_v0, %v780_v2  ;;  %v839_v21 = vsel %vm836_vm7, %v832_v11, %v833_v62  ;;  %v2442_v20 = vrot.slane %v2071_v39, 3  ;;  %v2443_v50 = vmov %v2441_v0 }
 0x444   :  { %v861_v12 = vpack.c.bf16 %v852_v38, %v851_v49  ;;  %v796_v27 = vmax.f32 %v771_v15, %v792_v16  ;;  %v793_v2 = vsel %vm786_vm2, %v778_v51, %v2443_v50  ;;  %v849_v46 = vmax.f32 %v824_v32, %v839_v21 }
 0x445   :  { %v816_v58 = vsel %vm811_vm6, %v2442_v20, %v806_v18  ;;  %v2444_v26 = vmax.f32 %v2067_v30, %v2087_v47  ;;  %v2201_v33 = vmul.u32 5, %v1765_v8  ;;  %v830_v62 = vrot.slane %v2071_v39, 4 }
 0x446   :  { %1611 = vmatpush3.bf16.msra.mxu0 %v861_v12  ;;  %v822_v15 = vmax.f32 %v797_v52, %v816_v58  ;;  %v2445_v18 = vmov 0.0   ;;  %v840_v25 = vsel %vm836_vm7, %v831_v44, %v832_v11  ;;  %v2446_v43 = vmov %v2442_v20 }
 0x447   :  { %v795_v53 = vmax.f32 %v2444_v26, %v793_v2  ;;  %1612 = vmatprep.subr.bf16.mxu0 %v2445_v18  ;;  %v2447_v51 = vrot.slane %v2069_v29, 3  ;;  %v2214_v47 = vmul.u32 5, %v1927_v10  ;;  %v860_v14 = vpack.c.bf16 %v850_v34, %v849_v46 }
 0x448   :  { %v848_v49 = vmax.f32 %v823_v24, %v840_v25  ;;  %v829_v32 = vrot.slane %v2069_v29, 4  ;;  %v841_v52 = vsel %vm836_vm7, %v830_v62, %v831_v44  ;;  %v2449_v59 = vrot.slane %v2067_v30, 3 }
 0x449   :  { %v817_v40 = vsel %vm811_vm6, %v2447_v51, %v2446_v43  ;;  %v2448_v11 = vmov %v2447_v51  ;;  %v847_v0 = vmax.f32 %v822_v15, %v841_v52  ;;  %vm148_vm8 = vcmp.eq.s32.totalorder %v1840_v54, %v2201_v33 }
 0x44a   :  { %v821_v38 = vmax.f32 %v796_v27, %v817_v40  ;;  %v818_v17 = vsel %vm811_vm6, %v2449_v59, %v2448_v11  ;;  %1613 = vmatpush3.bf16.msra.mxu0 %v860_v14  ;;  %v842_v12 = vsel %vm836_vm7, %v829_v32, %v830_v62  ;;  %vm149_vm9 = vcmp.eq.s32.totalorder %v1840_v54, %v2214_v47 }
 0x44b   :  { %v820_v16 = vmax.f32 %v795_v53, %v818_v17  ;;  %1614 = vmatprep.subr.bf16.mxu0 %v2445_v18  ;;  %v859_v34 = vpack.c.bf16 %v848_v49, %v847_v0  ;;  %v2450_v27 = vrot.slane %v2067_v30, 4  ;;  %v1528_v20 = vsel %vm148_vm8, 1.0, %v2445_v18 }
 0x44c   :  { %v846_v24 = vmax.f32 %v821_v38, %v842_v12  ;;  %v1529_v58 = vsel %vm149_vm9, 1.0, %v2445_v18  ;;  %v29_v46 = vmul.u32 5, %v1840_v54 }
 0x44d   :  { %v843_v44 = vsel %vm836_vm7, %v2450_v27, %v829_v32  ;;  %v857_v2 = vpack.c.bf16 %v1529_v58, %v1528_v20 }
 0x44e   :  { %1615 = vmatpush3.bf16.msra.mxu0 %v859_v34  ;;  %v845_v21 = vmax.f32 %v820_v16, %v843_v44  ;;  %v38_v15 = vadd.s32 5, %v29_v46  ;;  %vm30_vm10 = vcmp.ge.s32.totalorder %v1765_v8, %v29_v46  ;;  %vm31_vm11 = vcmp.ge.s32.totalorder %v1927_v10, %v29_v46 }
 0x44f   :  { %1616 = vmatprep.subr.bf16.mxu0 %v2445_v18  ;;  %vm32_vm15 = vcmp.ge.s32.totalorder %v1911_v7, %v29_v46  ;;  %vm33_vm1 = vcmp.ge.s32.totalorder %v1914_v9, %v29_v46 }
 0x450   :  { %v858_v50 = vpack.c.bf16 %v846_v24, %v845_v21  ;;  %vm39_vm12 = vcmp.lt.s32.totalorder %v1765_v8, %v38_v15  ;;  %vm40_vm13 = vcmp.lt.s32.totalorder %v1927_v10, %v38_v15  ;;  %vm41_vm2 = vcmp.lt.s32.totalorder %v1911_v7, %v38_v15 }
 0x451   :  { %vm47_vm14 = vmand %vm30_vm10, %vm39_vm12  ;;  %vm42_vm6 = vcmp.lt.s32.totalorder %v1914_v9, %v38_v15  ;;  %vm34_vm10 = vcmp.ge.s32.totalorder %v1895_v5, %v29_v46  ;;  %vm35_vm12 = vcmp.ge.s32.totalorder %v1898_v6, %v29_v46  ;;  %vm43_vm3 = vcmp.lt.s32.totalorder %v1895_v5, %v38_v15 }
 0x452   :  { %1617 = vmatpush3.bf16.msra.mxu0 %v858_v50  ;;  %vm48_vm7 = vmand %vm31_vm11, %vm40_vm13  ;;  %v1531_v26 = vsel %vm47_vm14, 1.0, %v2445_v18  ;;  %vm36_vm11 = vcmp.ge.s32.totalorder %v1879_v3, %v29_v46  ;;  %vm37_vm14 = vcmp.ge.s32.totalorder %v1882_v4, %v29_v46 }
 0x453   :  { %v1532_v53 = vsel %vm48_vm7, 1.0, %v2445_v18  ;;  %vm49_vm8 = vmand %vm32_vm15, %vm41_vm2  ;;  %vm45_vm15 = vcmp.lt.s32.totalorder %v1879_v3, %v38_v15 }
 0x454   :  { %v923_v62 = vpack.c.bf16 %v1532_v53, %v1531_v26  ;;  %vm50_vm9 = vmand %vm33_vm1, %vm42_vm6  ;;  %v1533_v25 = vsel %vm49_vm8, 1.0, %v2445_v18  ;;  %vm46_vm1 = vcmp.lt.s32.totalorder %v1882_v4, %v38_v15  ;;  %vm58_vm8 = vcmp.ge.s32.totalorder %v1840_v54, %v2214_v47 }
 0x455   :  { %1619 = vmatmul.mubr.msk.bf16.vlgmr.msra.gmra.mxu0 %vm2436_vm0, %v857_v2  ;;  %v1534_v10 = vsel %vm50_vm9, 1.0, %v2445_v18  ;;  %vm44_vm0 = vcmp.lt.s32.totalorder %v1898_v6, %v38_v15  ;;  %vm51_vm13 = vmand %vm34_vm10, %vm43_vm3  ;;  %vm57_vm3 = vcmp.ge.s32.totalorder %v1840_v54, %v2201_v33 }
 0x456   :  { %1624 = vmatprep.mubr.msk.bf16.mxu0 %vm457_vm5, %v923_v62  ;;  %v2259_v7 = vpack.c.bf16 %v1534_v10, %v1533_v25  ;;  %vm52_vm2 = vmand %vm35_vm12, %vm44_vm0  ;;  %v1535_v9 = vsel %vm51_vm13, 1.0, %v2445_v18  ;;  %v60_v25 = vadd.s32 5, %v2214_v47 }
 0x457   :  { %v1536_v5 = vsel %vm52_vm2, 1.0, %v2445_v18  ;;  %vm53_vm6 = vmand %vm36_vm11, %vm45_vm15  ;;  %vm2451_vm11 = vcmask 523264   ;;  %vm1187_vm15 = vcmask 1042432  }
 0x458   :  { %v2266_v6 = vpack.c.bf16 %v1536_v5, %v1535_v9  ;;  %vm54_vm7 = vmand %vm37_vm14, %vm46_vm1  ;;  %v1537_v43 = vsel %vm53_vm6, 1.0, %v2445_v18  ;;  %vm62_vm9 = vcmp.lt.s32.totalorder %v1840_v54, %v60_v25  ;;  %vm2453_vm1 = vcmask 1041408  }
 0x459   :  { %v1538_v51 = vsel %vm54_vm7, 1.0, %v2445_v18  ;;  %vm64_vm12 = vmand %vm58_vm8, %vm62_vm9  ;;  %vm1174_vm7 = vcmask 39936   ;;  %vm1447_vm8 = vcmask 31744   ;;  %vm1449_vm9 = vcmask 27648  }
 0x45a   :  { %v2270_v40 = vpack.c.bf16 %v1538_v51, %v1537_v43  ;;  %v1544_v47 = vsel %vm64_vm12, 1.0, %v2445_v18 }
 0x515   :  { %v900_v14 = vpop.f32.mrf.mxu0 }
 0x517   :  { %v1620_v49 = vpop.f32.mrf.mxu0 }
 0x519   :  { %v903_v3 = vpop.f32.mrf.mxu0 }
 0x51a   :  { %v927_v38 = vpack.c.bf16 %v903_v3, %v900_v14 }
 0x51b   :  { %v1621_v4 = vpop.f32.mrf.mxu0 }
 0x51c   :  { %v941_v32 = vsel %vm482_vm4, %v927_v38, 0  ;;  %1654 = vmatprep.subr.msk.bf16.mxu0 %vm482_vm4, %v927_v38  ;;  %v2452_v4 = vmov 0  }
 0x51d   :  { %1623 = vmatpush3.bf16.msra.mxu0 %v941_v32 }
 0x520   :  { %1625 = vmatmul.mubr.msk.bf16.vlgmr.msra.gmra.mxu0 %vm457_vm5, %v2259_v7 }
 0x521   :  { %1628 = vmatprep.mubr.msk.bf16.mxu0 %vm457_vm5, %v2266_v6 }
 0x528   :  { %1629 = vmatmul.mubr.msk.bf16.gmra.mxu0 %vm457_vm5, %v2270_v40 }
 0x529   :  { %1646 = vmatprep.mubr.msk.bf16.mxu0 %vm457_vm5, %v923_v62  ;;  %v59_v62 = vadd.s32 5, %v2201_v33 }
 0x52b   :  { %vm61_vm0 = vcmp.lt.s32.totalorder %v1840_v54, %v59_v62 }
 0x52c   :  { %vm63_vm10 = vmand %vm57_vm3, %vm61_vm0  ;;  %vm2456_vm0 = vcmask 261120  }
 0x52d   :  { %v1543_v14 = vsel %vm63_vm10, 1.0, %v2445_v18  ;;  %vm2455_vm3 = vmmov %vm2451_vm11 }
 0x52e   :  { %v2320_v38 = vpack.c.bf16 %v1544_v47, %v1543_v14  ;;  %v1680_v47 = vld [vmem:[%s2423_s3 + $0x5c] sm:$0xff]  }
 0x5e0   :  { %v1626_v52 = vpop.f32.mrf.mxu0 }
 0x5e1   :  { %v1010_v2 = vsub.f32 %v2071_v39, %v1626_v52 }
 0x5e2   :  { %v977_v11 = vpop.f32.mrf.mxu0 }
 0x5e3   :  { %v1020_v53 = vmul.f32 1.442695, %v1010_v2 }
 0x5e4   :  { %v1627_v59 = vpop.f32.mrf.mxu0 }
 0x5e5   :  { %v1011_v20 = vsub.f32 %v2073_v19, %v1627_v59 }
 0x5e6   :  { %v980_v17 = vpop.f32.mrf.mxu0 }
 0x5e7   :  { %v1009_v26 = vsub.f32 %v2069_v29, %v980_v17 }
 0x5e8   :  { %v1630_v0 = vpop.f32.mrf.mxu0 }
 0x5e9   :  { %v1014_v16 = vsub.f32 %v2099_v55, %v1630_v0  ;;  %v1022_v55 = vmul.f32 1.442695, %v1011_v20 }
 0x5ea   :  { %v993_v12 = vpop.f32.mrf.mxu0 }
 0x5eb   :  { %v1028_v34 = vmul.f32 1.442695, %v1014_v16  ;;  %v1012_v27 = vsub.f32 %v2075_v31, %v993_v12  ;;  %v1008_v31 = vsub.f32 %v2067_v30, %v977_v11 }
 0x5ec   :  { %v1631_v24 = vpop.f32.mrf.mxu0 }
 0x5ed   :  { %v1015_v44 = vsub.f32 %v2121_v22, %v1631_v24  ;;  %1690 = vpow2.f32 %v1028_v34  ;;  %v1024_v46 = vmul.f32 1.442695, %v1012_v27  ;;  %v1018_v22 = vmul.f32 1.442695, %v1009_v26 }
 0x5ee   :  { %v996_v21 = vpop.f32.mrf.mxu0  ;;  %v1016_v19 = vmul.f32 1.442695, %v1008_v31  ;;  %v140_v34 = vmul.u32 32, %v1765_v8 }
 0x5ef   :  { %v1030_v58 = vmul.f32 1.442695, %v1015_v44  ;;  %v1013_v50 = vsub.f32 %v2080_v37, %v996_v21 }
 0x5f0   :  { %v143_v24 = vadd.s32 32, %v140_v34  ;;  %vm141_vm13 = vcmp.ge.s32.totalorder %v1840_v54, %v140_v34 }
 0x5f1   :  { %1692 = vpow2.f32 %v1030_v58  ;;  %v1026_v15 = vmul.f32 1.442695, %v1013_v50 }
 0x5f2   :  { %vm144_vm14 = vcmp.lt.s32.totalorder %v1840_v54, %v143_v24 }
 0x5f3   :  { %1694 = vpow2.f32 %v1026_v15 }
 0x5f4   :  { %1696 = vpow2.f32 %v1024_v46 }
 0x5f5   :  { %1698 = vpow2.f32 %v1022_v55 }
 0x5f6   :  { %1700 = vpow2.f32 %v1020_v53 }
 0x5f7   :  { %1702 = vpow2.f32 %v1018_v22 }
 0x5f8   :  { %1704 = vpow2.f32 %v1016_v19 }
 0x5fa   :  { %v2289_v37 = vpop.eup %1690 }
 0x5fe   :  { %v2291_v39 = vpop.eup %1692 }
 0x5ff   :  { %v1040_v29 = vpack.c.bf16 %v2291_v39, %v2289_v37 }
 0x600   :  { %v2297_v10 = vpop.eup %1694 }
 0x601   :  { %1633 = vmatpush3.bf16.msra.mxu1 %v1040_v29  ;;  %v2299_v30 = vpop.eup %1696 }
 0x602   :  { %1634 = vmatprep.subr.bf16.mxu1 %v2445_v18  ;;  %v1039_v9 = vpack.c.bf16 %v2297_v10, %v2299_v30  ;;  %v2310_v5 = vpop.eup %1698 }
 0x603   :  { %v2312_v43 = vpop.eup %1700 }
 0x604   :  { %v1038_v33 = vpack.c.bf16 %v2310_v5, %v2312_v43  ;;  %v1703_v51 = vpop.eup %1702 }
 0x605   :  { %1635 = vmatpush3.bf16.msra.mxu1 %v1039_v9  ;;  %v1705_v49 = vpop.eup %1704 }
 0x606   :  { %1636 = vmatprep.subr.bf16.mxu1 %v2445_v18  ;;  %v1037_v3 = vpack.c.bf16 %v1703_v51, %v1705_v49 }
 0x609   :  { %1637 = vmatpush3.bf16.msra.mxu1 %v1038_v33 }
 0x60a   :  { %1638 = vmatprep.subr.bf16.mxu1 %v2445_v18 }
 0x60d   :  { %1639 = vmatpush3.bf16.msra.mxu1 %v1037_v3  ;;  %v1686_v3 = vld [vmem:[%s2423_s3 + $0x2c] sm:$0xff]  }
 0x610   :  { %1641 = vmatmul.mubr.msk.bf16.vlgmr.msra.gmra.mxu1 %vm2451_vm11, %v2320_v38 }
 0x611   :  { %1228 = vmatprep.mubr.bf16.mxu1 %v2452_v4 }
 0x6d0   :  { %v1078_v32 = vpop.f32.mrf.mxu1 }
 0x6d1   :  { %1706 = vrcp.f32 %v1078_v32  ;;  %v1687_v32 = vld [vmem:[%s2423_s3 + $0x24] sm:$0xff]  }
 0x6d2   :  { %v1642_v52 = vpop.f32.mrf.mxu1 }
 0x6d4   :  { %v1081_v11 = vpop.f32.mrf.mxu1 }
 0x6d5   :  { %1708 = vrcp.f32 %v1081_v11 }
 0x6d6   :  { %v1643_v59 = vpop.f32.mrf.mxu1 }
 0x6de   :  { %v1707_v17 = vpop.eup %1706 }
 0x6e2   :  { %v1709_v0 = vpop.eup %1708 }
 0x6e3   :  { %v1087_v16 = vpack.c.bf16 %v1709_v0, %v1707_v17 }
 0x6e5   :  { %1655 = vmatprep.subr.msk.bf16.mxu0 %vm482_vm4, %v1087_v16  ;;  %v1089_v12 = vsel %vm482_vm4, %v1087_v16, 0  ;;  %vm146_vm4 = vmand %vm141_vm13, %vm144_vm14 }
 0x6e6   :  { %1645 = vmatpush3.bf16.msra.mxu0 %v1089_v12  ;;  %v1550_v27 = vsel %vm146_vm4, 1.0, %v2445_v18 }
 0x6e7   :  { %v1172_v21 = vpack.c.bf16 %v1550_v27, %v1550_v27 }
 0x6e9   :  { %1647 = vmatmul.mubr.msk.bf16.vlgmr.msra.gmra.mxu0 %vm457_vm5, %v2259_v7  ;;  %v1714_v7 = vmov 65535  }
 0x6ea   :  { %1650 = vmatprep.mubr.msk.bf16.mxu0 %vm457_vm5, %v2266_v6  ;;  %v1188_v44 = vsel %vm2453_vm1, 4294967295, %v1714_v7  ;;  %v139_v6 = vadd.s32 128, %v1840_v54 }
 0x6ec   :  { %vm145_vm2 = vcmp.lt.s32.totalorder %v139_v6, %v143_v24 }
 0x6f1   :  { %1651 = vmatmul.mubr.msk.bf16.gmra.mxu0 %vm457_vm5, %v2270_v40  ;;  %vm142_vm5 = vcmp.ge.s32.totalorder %v139_v6, %v140_v34  ;;  %v1189_v40 = vsel %vm1187_vm15, %v1188_v44, 0 }
 0x6f2   :  { %1325 = vmatprep.mubr.bf16.mxu0 %v2452_v4  ;;  %vm147_vm6 = vmand %vm142_vm5, %vm145_vm2  ;;  %v1191_v58 = vand.u32 %v1189_v40, %v1172_v21 }
 0x6f3   :  { %v1551_v8 = vsel %vm147_vm6, 1.0, %v2445_v18 }
 0x6f4   :  { %v1173_v20 = vpack.c.bf16 %v1551_v8, %v1551_v8 }
 0x6f6   :  { %v1194_v50 = vand.u32 %v1189_v40, %v1173_v20 }
 0x6f8   :  { %1210 = vmatprep.subr.bf16.mxu1 %v1194_v50 }
 0x6f9   :  { %1211 = vmatpush1.bf16.msra.mxu1 %v1191_v58 }
 0x6fa   :  { %1406 = vmatprep.subr.bf16.mxu1 %v2452_v4 }
 0x7a9   :  { %v1648_v2 = vpop.f32.mrf.mxu0 }
 0x7aa   :  { %v1158_v62 = vmul.f32 %v2312_v43, %v1648_v2 }
 0x7ab   :  { %v1125_v46 = vpop.f32.mrf.mxu0 }
 0x7ac   :  { %v1156_v26 = vmul.f32 %v1705_v49, %v1125_v46  ;;  %v1685_v49 = vld [vmem:[%s2423_s3 + $0x34] sm:$0xff]  }
 0x7ad   :  { %v1649_v15 = vpop.f32.mrf.mxu0 }
 0x7ae   :  { %v1159_v18 = vmul.f32 %v2310_v5, %v1649_v15 }
 0x7af   :  { %v1128_v55 = vpop.f32.mrf.mxu0 }
 0x7b0   :  { %v1157_v54 = vmul.f32 %v1703_v51, %v1128_v55  ;;  %v1165_v29 = vpack.c.bf16 %v1159_v18, %v1158_v62 }
 0x7b1   :  { %v1652_v53 = vpop.f32.mrf.mxu0 }
 0x7b2   :  { %v1164_v31 = vpack.c.bf16 %v1157_v54, %v1156_v26  ;;  %v1162_v14 = vmul.f32 %v2289_v37, %v1652_v53  ;;  %v1683_v37 = vld [vmem:[%s2423_s3 + $0x44] sm:$0xff]  }
 0x7b3   :  { %v1141_v22 = vpop.f32.mrf.mxu0 }
 0x7b4   :  { %1552 = vmatmul.mubr.msk.bf16.vlgmr.msra.gmra.mxu1 %vm1174_vm7, %v1164_v31  ;;  %v1160_v33 = vmul.f32 %v2299_v30, %v1141_v22  ;;  %v1684_v30 = vld [vmem:[%s2423_s3 + $0x3c] sm:$0xff]  }
 0x7b5   :  { %1238 = vmatprep.mubr.bf16.mxu1 %v2452_v4  ;;  %v1653_v19 = vpop.f32.mrf.mxu0  ;;  %1407 = vmatpush1.bf16.msra.mxu1 %v1680_v47 }
 0x7b6   :  { %v1163_v5 = vmul.f32 %v2291_v39, %v1653_v19  ;;  %1408 = vmatprep.subr.bf16.mxu1 %v2452_v4  ;;  %v1682_v39 = vld [vmem:[%s2423_s3 + $0x4c] sm:$0xff]  }
 0x7b7   :  { %v1144_v25 = vpop.f32.mrf.mxu0  ;;  %v2454_v19 = vld [vmem:[#allocation3_spill] sm:$0xff] }
 0x7b8   :  { %v1161_v9 = vmul.f32 %v2297_v10, %v1144_v25  ;;  %v1167_v43 = vpack.c.bf16 %v1163_v5, %v1162_v14  ;;  %v1681_v10 = vld [vmem:[%s2423_s3 + $0x54] sm:$0xff]  }
 0x7b9   :  { %1409 = vmatpush1.bf16.msra.mxu1 %v1681_v10 }
 0x7ba   :  { %v1166_v51 = vpack.c.bf16 %v1161_v9, %v1160_v33  ;;  %1410 = vmatprep.subr.bf16.mxu1 %v2452_v4 }
 0x7bc   :  { %1553 = vmatmul.mubr.msk.bf16.gmra.mxu1 %vm1174_vm7, %v1165_v29 }
 0x7bd   :  { %1248 = vmatprep.mubr.bf16.mxu1 %v2452_v4  ;;  %1411 = vmatpush1.bf16.msra.mxu1 %v1682_v39 }
 0x7be   :  { %1412 = vmatprep.subr.bf16.mxu1 %v2452_v4 }
 0x7c1   :  { %1413 = vmatpush1.bf16.msra.mxu1 %v1683_v37 }
 0x7c2   :  { %1414 = vmatprep.subr.bf16.mxu1 %v2452_v4 }
 0x7c4   :  { %1554 = vmatmul.mubr.msk.bf16.gmra.mxu1 %vm1174_vm7, %v1166_v51 }
 0x7c5   :  { %1258 = vmatprep.mubr.bf16.mxu1 %v2452_v4  ;;  %1415 = vmatpush1.bf16.msra.mxu1 %v1684_v30 }
 0x7c6   :  { %1416 = vmatprep.subr.bf16.mxu1 %v2452_v4 }
 0x7c9   :  { %1417 = vmatpush1.bf16.msra.mxu1 %v1685_v49 }
 0x7ca   :  { %1418 = vmatprep.subr.bf16.mxu1 %v2452_v4 }
 0x7cc   :  { %1555 = vmatmul.mubr.msk.bf16.gmra.mxu1 %vm1174_vm7, %v1167_v43 }
 0x7cd   :  { %1419 = vmatpush1.bf16.msra.mxu1 %v1686_v3 }
 0x7ce   :  { %1420 = vmatprep.subr.bf16.mxu1 %v2452_v4 }
 0x7d1   :  { %1421 = vmatpush1.bf16.msra.mxu1 %v1687_v32 }
 0x7d2   :  { %1434 = vmatprep.subr.bf16.mxu1 %v2452_v4 }
 0x874   :  { %v1230_v52 = vpop.f32.mrf.mxu1 }
 0x875   :  { %v1269_v62 = vmul.f32 %v1230_v52, %v2454_v19 }
 0x876   :  { %v1232_v11 = vpop.f32.mrf.mxu1 }
 0x878   :  { %v1234_v59 = vpop.f32.mrf.mxu1 }
 0x87a   :  { %v1236_v17 = vpop.f32.mrf.mxu1 }
 0x87c   :  { %v1240_v0 = vpop.f32.mrf.mxu1 }
 0x87d   :  { %v1273_v22 = vmul.f32 %v1240_v0, %v2005_v63 }
 0x87e   :  { %v1242_v16 = vpop.f32.mrf.mxu1 }
 0x880   :  { %v1244_v12 = vpop.f32.mrf.mxu1 }
 0x882   :  { %v1246_v34 = vpop.f32.mrf.mxu1 }
 0x883   :  { %v1276_v53 = vmul.f32 %v1246_v34, %v2010_v13  ;;  %v1271_v13 = vmul.f32 %v1234_v59, %v1980_v42 }
 0x884   :  { %v1250_v24 = vpop.f32.mrf.mxu1 }
 0x886   :  { %v1252_v27 = vpop.f32.mrf.mxu1 }
 0x887   :  { %v1278_v15 = vmul.f32 %v1252_v27, %v2018_v23 }
 0x888   :  { %v1254_v7 = vpop.f32.mrf.mxu1 }
 0x889   :  { %v1279_v26 = vmul.f32 %v1254_v7, %v2021_v35  ;;  %v1270_v35 = vmul.f32 %v1232_v11, %v1977_v41  ;;  %v1689_v41 = vld [vmem:[%s2423_s3 + $0x64] sm:$0xff]  }
 0x88a   :  { %v1256_v44 = vpop.f32.mrf.mxu1 }
 0x88b   :  { %v1280_v58 = vmul.f32 %v1256_v44, %v2031_v45  ;;  %v1274_v45 = vmul.f32 %v1242_v16, %v1997_v60  ;;  %v1285_v60 = vpack.c.bf16 %v1271_v13, %v1269_v62 }
 0x88c   :  { %v1260_v6 = vpop.f32.mrf.mxu1 }
 0x88d   :  { %v1281_v46 = vmul.f32 %v1260_v6, %v2049_v57  ;;  %v1290_v31 = vpack.c.bf16 %v1280_v58, %v1278_v15  ;;  %v1272_v57 = vmul.f32 %v1236_v17, %v1989_v48  ;;  %v1288_v23 = vpack.c.bf16 %v1276_v53, %v1274_v45  ;;  %v1688_v48 = vld [vmem:[%s2423_s3 + $0x6c] sm:$0xff]  }
 0x88e   :  { %v1262_v21 = vpop.f32.mrf.mxu1  ;;  %1435 = vmatpush2.bf16.msra.mxu1 %v1688_v48 }
 0x88f   :  { %v1282_v50 = vmul.f32 %v1262_v21, %v2040_v28  ;;  %v1275_v28 = vmul.f32 %v1244_v12, %v2000_v61  ;;  %1436 = vmatprep.subr.bf16.mxu1 %v2452_v4  ;;  %v2457_v4 = vld [vmem:[#allocation2_spill] sm:$0xff] }
 0x890   :  { %v1264_v40 = vpop.f32.mrf.mxu1 }
 0x891   :  { %v1283_v8 = vmul.f32 %v1264_v40, %v2043_v56  ;;  %v1277_v56 = vmul.f32 %v1250_v24, %v2026_v36  ;;  %v1287_v18 = vpack.c.bf16 %v1275_v28, %v1273_v22  ;;  %v1286_v36 = vpack.c.bf16 %v1272_v57, %v1270_v35 }
 0x892   :  { %v1266_v20 = vpop.f32.mrf.mxu1  ;;  %1437 = vmatpush2.bf16.msra.mxu1 %v1689_v41 }
 0x893   :  { %v1284_v2 = vmul.f32 %v1266_v20, %v2056_v1  ;;  %v1291_v54 = vpack.c.bf16 %v1283_v8, %v1281_v46  ;;  %v1289_v1 = vpack.c.bf16 %v1279_v26, %v1277_v56 }
 0x895   :  { %v1292_v55 = vpack.c.bf16 %v1284_v2, %v1282_v50 }
 0x897   :  { %1301 = vmatprep.subr.bf16.mxu0 %v1292_v55 }
 0x898   :  { %1302 = vmatpush1.bf16.msra.mxu0 %v1291_v54 }
 0x899   :  { %1303 = vmatprep.subr.bf16.mxu0 %v1290_v31 }
 0x89c   :  { %1304 = vmatpush1.bf16.msra.mxu0 %v1289_v1 }
 0x89d   :  { %1305 = vmatprep.subr.bf16.mxu0 %v1288_v23 }
 0x8a0   :  { %1306 = vmatpush1.bf16.msra.mxu0 %v1287_v18 }
 0x8a1   :  { %1307 = vmatprep.subr.bf16.mxu0 %v1286_v36 }
 0x8a4   :  { %1308 = vmatpush1.bf16.msra.mxu0 %v1285_v60 }
 0x8a7   :  { %1556 = vmatmul.mubr.msk.bf16.vlgmr.msra.gmra.mxu0 %vm2455_vm3, %v2320_v38  ;;  %v179_v38 = vld [vmem:[%s2423_s3 + $0x74] sm:$0x1] }
 0x8a8   :  { %v1338_v33 = vunpack.c.l.bf16 %v179_v38 }
 0x8aa   :  { %v1342_v51 = vrot.slane %v1338_v33, %v2457_v4 }
 0x967   :  { %v1327_v42 = vpop.f32.mrf.mxu0 }
 0x969   :  { %v1329_v61 = vpop.f32.mrf.mxu0 }
 0x96b   :  { %v1331_v63 = vpop.f32.mrf.mxu0 }
 0x96c   :  { %v1336_v9 = vpack.c.bf16 %v1331_v63, %v1327_v42 }
 0x96d   :  { %v1333_v29 = vpop.f32.mrf.mxu0 }
 0x96e   :  { %v1337_v25 = vpack.c.bf16 %v1333_v29, %v1329_v61 }
 0x970   :  { %1567 = vmatprep.mubr.msk.bf16.mxu1 %vm2456_vm0, %v1337_v25 }
 0x971   :  { %1439 = vmatmul.mubr.bf16.vlgmr.msra.gmra.mxu1 %v1336_v9 }
 0xa31   :  { %v1440_v5 = vpop.f32.mrf.mxu1 }
 0xa32   :  { %v1441_v14 = vadd.f32 %v1440_v5, %v1342_v51 }
 0xa33   :  { %v1442_v43 = vpop.f32.mrf.mxu1 }
 0xa34   :  { %1448 = vst.msk [vmem:[%s2427_s4] sm:$0xff] %vm1447_vm8, %v1441_v14 }
 0xa35   :  { %v1443_v47 = vpop.f32.mrf.mxu1 }
 0xa36   :  { %v1444_v10 = vadd.f32 %v1443_v47, %v1342_v51 }
 0xa37   :  { %v1445_v39 = vpop.f32.mrf.mxu1 }
 0xa38   :  { %1450 = vst.msk [vmem:[%s2427_s4 + $0x8] sm:$0xf] %vm1449_vm9, %v1444_v10 }

</bundles_post_ra>
